<compile_context>
chip_gen: v6e
topology: v6e:2x2x1
jax: 0.10.0
libtpu: 0.0.40
codegen_flags: <defaults>
</compile_context>

<pallas_src>
import functools

import jax
import jax.numpy as jnp
from jax import lax
from jax.experimental import pallas as pl
from jax.experimental.pallas import tpu as pltpu

WINDOW = 5          # conv kernel size
HIDDEN = 16         # hidden channels of the first conv
PAD = WINDOW // 2   # 'same' padding for odd kernel, stride 1
LANE = 128
SUBLANE = 8


def _round_up(n, m):
    return ((n + m - 1) // m) * m


def _cdiv(a, b):
    return -(-a // b)


def _pick_block_b(B, Tc, budget_bytes=8 << 20, cap=1024):
    """Largest batch tile (multiple of 8) whose f32 working set fits the budget,
    rebalanced so the padded batch wastes as little work as possible."""
    b8 = _round_up(B, SUBLANE)
    per_row = 512 * Tc                      # conservative per-row VMEM bytes (h, acc, temps, 2x I/O)
    bb = max(SUBLANE, min(budget_bytes // per_row, cap, b8))
    bb = max(SUBLANE, (bb // SUBLANE) * SUBLANE)
    n_tiles = _cdiv(b8, bb)
    bb = _round_up(_cdiv(b8, n_tiles), SUBLANE)   # balance tiles -> minimal padding
    return bb


def _decomposer_kernel(x_ref, w1_ref, b1_ref, w2_ref, b2_ref,
                       trend_ref, resid_ref, *, t_valid):
    # x_ref:     (BB, Tc + 4*PAD) f32  input slab; real samples live at lanes
    #                                  [2*PAD, 2*PAD + t_valid), zeros elsewhere.
    # w1_ref:    (HIDDEN, WINDOW) f32  conv1 weight (torch (16,1,5) squeezed)
    # b1_ref:    (HIDDEN, 1)      f32  conv1 bias
    # w2_ref:    (HIDDEN, WINDOW) f32  conv2 weight (torch (1,16,5) squeezed)
    # b2_ref:    (1,)             f32  conv2 bias (SMEM scalar)
    # trend_ref, resid_ref: (BB, Tc) f32  lane-dense outputs (Tc multiple of 128)
    x = x_ref[...]                               # (BB, Ti)
    Tc = trend_ref.shape[-1]
    Th = Tc + 2 * PAD                            # conv1 output incl. halo for conv2

    w1 = w1_ref[...]                             # (HIDDEN, WINDOW)
    b1 = b1_ref[...]                             # (HIDDEN, 1)
    w2 = w2_ref[...]                             # (HIDDEN, WINDOW)

    # Hoist per-tap weight columns once (each (1, HIDDEN, 1)); reused in the loops.
    w1c = [w1[:, k:k + 1][None, :, :] for k in range(WINDOW)]
    w2c = [w2[:, k:k + 1][None, :, :] for k in range(WINDOW)]

    # ---- Conv1d(1 -> HIDDEN, 'same') + ReLU : static lane slices + VPU broadcast FMAs.
    # h[j] corresponds to output position j - PAD (computed with a PAD halo on each
    # side so conv2 below needs no extra padding).  Tap 0 initialises h (bias fused).
    h = x[:, 0:Th][:, None, :] * w1c[0] + b1[None, :, :]
    for k in range(1, WINDOW):
        h = h + x[:, k:k + Th][:, None, :] * w1c[k]
    h = jnp.maximum(h, 0.0)

    # Zero the halo / right-pad region so conv2 sees exact 'same' zero padding of h.
    # (relu output >= 0, so a 0/1 multiplicative mask is exact and cheaper than where.)
    j = lax.broadcasted_iota(jnp.int32, (1, 1, Th), 2)
    mask = ((j >= PAD) & (j < PAD + t_valid)).astype(jnp.float32)
    h = h * mask

    # ---- Conv1d(HIDDEN -> 1, 'same') : static lane slices + FMAs, one sublane reduce.
    acc = h[:, :, 0:Tc] * w2c[0]
    for k in range(1, WINDOW):
        acc = acc + h[:, :, k:k + Tc] * w2c[k]
    trend = jnp.sum(acc, axis=1) + b2_ref[0]     # (BB, Tc)

    trend_ref[...] = trend
    resid_ref[...] = x[:, 2 * PAD:2 * PAD + Tc] - trend


def deep_trend_decomposer(x, w1, b1, w2, b2, *, block_b=None):
    """x: (B, T, 1) like the PyTorch forward input. Returns (trend, residual), both (B, 1, T)."""
    B, T, _ = x.shape
    x2d = x[..., 0].astype(jnp.float32)                     # (B, T)

    Tc = _round_up(T, LANE)                                 # lane-dense compute/output length
    Ti = Tc + 4 * PAD                                       # input with a 2*PAD halo on each side
    if block_b is None:
        block_b = _pick_block_b(B, Tc)
    Bp = _round_up(B, block_b)                              # sublane-dense batch, multiple of tile

    xp = jnp.zeros((Bp, Ti), jnp.float32)
    xp = xp.at[:B, 2 * PAD:2 * PAD + T].set(x2d)

    grid = (Bp // block_b,)

    trend_p, resid_p = pl.pallas_call(
        functools.partial(_decomposer_kernel, t_valid=T),
        out_shape=(jax.ShapeDtypeStruct((Bp, Tc), jnp.float32),
                   jax.ShapeDtypeStruct((Bp, Tc), jnp.float32)),
        grid_spec=pltpu.PrefetchScalarGridSpec(
            num_scalar_prefetch=0,
            grid=grid,
            in_specs=[
                pl.BlockSpec((block_b, Ti), lambda i: (i, 0)),        # x batch tile
                pl.BlockSpec((HIDDEN, WINDOW), lambda i: (0, 0)),     # w1 (replicated)
                pl.BlockSpec((HIDDEN, 1), lambda i: (0, 0)),          # b1
                pl.BlockSpec((HIDDEN, WINDOW), lambda i: (0, 0)),     # w2
                pl.BlockSpec(memory_space=pltpu.MemorySpace.SMEM),    # b2 scalar
            ],
            out_specs=(pl.BlockSpec((block_b, Tc), lambda i: (i, 0)),
                       pl.BlockSpec((block_b, Tc), lambda i: (i, 0))),
        ),
        compiler_params=pltpu.CompilerParams(
            dimension_semantics=("parallel",)),
    )(xp,
      w1.astype(jnp.float32),
      b1.reshape(HIDDEN, 1).astype(jnp.float32),
      w2.astype(jnp.float32),
      b2.reshape(1).astype(jnp.float32))

    trend = trend_p[:B, :T][:, None, :]                     # (B, 1, T)
    resid = resid_p[:B, :T][:, None, :]
    return trend, resid


def _reference(x, w1, b1, w2, b2):
    """Pure-JAX reference with exact PyTorch Conv1d ('same', cross-correlation) semantics."""
    xt = jnp.transpose(x, (0, 2, 1)).astype(jnp.float32)    # (B, 1, T)
    B, _, T = xt.shape
    xp = jnp.pad(xt, ((0, 0), (0, 0), (PAD, PAD)))
    h = jnp.zeros((B, HIDDEN, T), jnp.float32)
    for k in range(WINDOW):
        h = h + w1[:, k][None, :, None] * xp[:, :, k:k + T]
    h = jax.nn.relu(h + b1[None, :, None])
    hp = jnp.pad(h, ((0, 0), (0, 0), (PAD, PAD)))
    tr = jnp.zeros((B, 1, T), jnp.float32)
    for k in range(WINDOW):
        tr = tr + jnp.sum(w2[:, k][None, :, None] * hp[:, :, k:k + T],
                          axis=1, keepdims=True)
    tr = tr + b2[0]
    return tr, xt - tr


def _check(B, T, key, block_b=None):
    k_x, k_w1, k_b1, k_w2, k_b2 = jax.random.split(key, 5)
    x = jax.random.normal(k_x, (B, T, 1), jnp.float32)
    w1 = jax.random.normal(k_w1, (HIDDEN, WINDOW), jnp.float32) * 0.3
    b1 = jax.random.normal(k_b1, (HIDDEN,), jnp.float32) * 0.1
    w2 = jax.random.normal(k_w2, (HIDDEN, WINDOW), jnp.float32) * 0.3
    b2 = jax.random.normal(k_b2, (1,), jnp.float32) * 0.1

    trend, resid = deep_trend_decomposer(x, w1, b1, w2, b2, block_b=block_b)
    jax.block_until_ready((trend, resid))

    trend_ref, resid_ref = _reference(x, w1, b1, w2, b2)
    assert trend.shape == (B, 1, T) and resid.shape == (B, 1, T)
    assert jnp.allclose(trend, trend_ref, atol=1e-4, rtol=1e-4)
    assert jnp.allclose(resid, resid_ref, atol=1e-4, rtol=1e-4)


if __name__ == "__main__":
    key = jax.random.PRNGKey(0)
    k0, k1, k2 = jax.random.split(key, 3)

    # Small shape matching the module's expected (batch, seq, features=1) input.
    _check(B=2, T=16, key=k0)
    # Shape exercising lane padding, the valid-length mask and the adaptive tile picker.
    _check(B=9, T=130, key=k1)
    # Force a small batch tile to exercise the multi-step grid / pipelining path.
    _check(B=9, T=130, key=k2, block_b=8)

    print("KERNEL_OK")
</pallas_src>

<mosaic_0001>
module attributes {stable_mosaic.version = 11 : i64} {
  func.func @_decomposer_kernel(%arg0: i32, %arg1: memref<8x136xf32, #tpu.memory_space<vmem>>, %arg2: memref<16x5xf32, #tpu.memory_space<vmem>>, %arg3: memref<16x1xf32, #tpu.memory_space<vmem>>, %arg4: memref<16x5xf32, #tpu.memory_space<vmem>>, %arg5: memref<1xf32, #tpu.memory_space<smem>>, %arg6: memref<8x128xf32, #tpu.memory_space<vmem>>, %arg7: memref<8x128xf32, #tpu.memory_space<vmem>>) attributes {dimension_semantics = [#tpu.dimension_semantics<parallel>], iteration_bounds = array<i64: 1>, scalar_prefetch = 0 : i64, scratch_operands = 0 : i64, tpu.core_type = #tpu.core_type<tc>, window_params = [{transform_indices = @transform_0, window_bounds = array<i64: 8, 136>}, {pipeline_mode = #tpu.pipeline_mode<synchronous>, transform_indices = @transform_1, window_bounds = array<i64: 16, 5>}, {pipeline_mode = #tpu.pipeline_mode<synchronous>, transform_indices = @transform_2, window_bounds = array<i64: 16, 1>}, {pipeline_mode = #tpu.pipeline_mode<synchronous>, transform_indices = @transform_3, window_bounds = array<i64: 16, 5>}, {transform_indices = @transform_4, window_bounds = array<i64: 1>}, {transform_indices = @transform_5, window_bounds = array<i64: 8, 128>}, {transform_indices = @transform_6, window_bounds = array<i64: 8, 128>}]} {
    %c0 = arith.constant 0 : index
    %c0_0 = arith.constant 0 : index
    %0 = vector.load %arg1[%c0, %c0_0] : memref<8x136xf32, #tpu.memory_space<vmem>>, vector<8x136xf32>
    %c0_1 = arith.constant 0 : index
    %c0_2 = arith.constant 0 : index
    %1 = vector.load %arg2[%c0_1, %c0_2] : memref<16x5xf32, #tpu.memory_space<vmem>>, vector<16x5xf32>
    %c0_3 = arith.constant 0 : index
    %c0_4 = arith.constant 0 : index
    %2 = vector.load %arg3[%c0_3, %c0_4] : memref<16x1xf32, #tpu.memory_space<vmem>>, vector<16x1xf32>
    %c0_5 = arith.constant 0 : index
    %c0_6 = arith.constant 0 : index
    %3 = vector.load %arg4[%c0_5, %c0_6] : memref<16x5xf32, #tpu.memory_space<vmem>>, vector<16x5xf32>
    %4 = vector.extract_strided_slice %1 {offsets = [0, 0], sizes = [16, 1], strides = [1, 1]} : vector<16x5xf32> to vector<16x1xf32>
    %5 = vector.shape_cast %4 : vector<16x1xf32> to vector<1x16x1xf32>
    %6 = vector.extract_strided_slice %1 {offsets = [0, 1], sizes = [16, 1], strides = [1, 1]} : vector<16x5xf32> to vector<16x1xf32>
    %7 = vector.shape_cast %6 : vector<16x1xf32> to vector<1x16x1xf32>
    %8 = vector.extract_strided_slice %1 {offsets = [0, 2], sizes = [16, 1], strides = [1, 1]} : vector<16x5xf32> to vector<16x1xf32>
    %9 = vector.shape_cast %8 : vector<16x1xf32> to vector<1x16x1xf32>
    %10 = vector.extract_strided_slice %1 {offsets = [0, 3], sizes = [16, 1], strides = [1, 1]} : vector<16x5xf32> to vector<16x1xf32>
    %11 = vector.shape_cast %10 : vector<16x1xf32> to vector<1x16x1xf32>
    %12 = vector.extract_strided_slice %1 {offsets = [0, 4], sizes = [16, 1], strides = [1, 1]} : vector<16x5xf32> to vector<16x1xf32>
    %13 = vector.shape_cast %12 : vector<16x1xf32> to vector<1x16x1xf32>
    %14 = vector.extract_strided_slice %3 {offsets = [0, 0], sizes = [16, 1], strides = [1, 1]} : vector<16x5xf32> to vector<16x1xf32>
    %15 = vector.shape_cast %14 : vector<16x1xf32> to vector<1x16x1xf32>
    %16 = vector.extract_strided_slice %3 {offsets = [0, 1], sizes = [16, 1], strides = [1, 1]} : vector<16x5xf32> to vector<16x1xf32>
    %17 = vector.shape_cast %16 : vector<16x1xf32> to vector<1x16x1xf32>
    %18 = vector.extract_strided_slice %3 {offsets = [0, 2], sizes = [16, 1], strides = [1, 1]} : vector<16x5xf32> to vector<16x1xf32>
    %19 = vector.shape_cast %18 : vector<16x1xf32> to vector<1x16x1xf32>
    %20 = vector.extract_strided_slice %3 {offsets = [0, 3], sizes = [16, 1], strides = [1, 1]} : vector<16x5xf32> to vector<16x1xf32>
    %21 = vector.shape_cast %20 : vector<16x1xf32> to vector<1x16x1xf32>
    %22 = vector.extract_strided_slice %3 {offsets = [0, 4], sizes = [16, 1], strides = [1, 1]} : vector<16x5xf32> to vector<16x1xf32>
    %23 = vector.shape_cast %22 : vector<16x1xf32> to vector<1x16x1xf32>
    %24 = vector.extract_strided_slice %0 {offsets = [0, 0], sizes = [8, 132], strides = [1, 1]} : vector<8x136xf32> to vector<8x132xf32>
    %25 = vector.shape_cast %24 : vector<8x132xf32> to vector<8x1x132xf32>
    %26 = vector.broadcast %25 : vector<8x1x132xf32> to vector<8x16x132xf32>
    %27 = vector.broadcast %5 : vector<1x16x1xf32> to vector<8x16x132xf32>
    %28 = arith.mulf %26, %27 : vector<8x16x132xf32>
    %29 = vector.shape_cast %2 : vector<16x1xf32> to vector<1x16x1xf32>
    %30 = vector.broadcast %29 : vector<1x16x1xf32> to vector<8x16x132xf32>
    %31 = arith.addf %28, %30 : vector<8x16x132xf32>
    %32 = vector.extract_strided_slice %0 {offsets = [0, 1], sizes = [8, 132], strides = [1, 1]} : vector<8x136xf32> to vector<8x132xf32>
    %33 = vector.shape_cast %32 : vector<8x132xf32> to vector<8x1x132xf32>
    %34 = vector.broadcast %33 : vector<8x1x132xf32> to vector<8x16x132xf32>
    %35 = vector.broadcast %7 : vector<1x16x1xf32> to vector<8x16x132xf32>
    %36 = arith.mulf %34, %35 : vector<8x16x132xf32>
    %37 = arith.addf %31, %36 : vector<8x16x132xf32>
    %38 = vector.extract_strided_slice %0 {offsets = [0, 2], sizes = [8, 132], strides = [1, 1]} : vector<8x136xf32> to vector<8x132xf32>
    %39 = vector.shape_cast %38 : vector<8x132xf32> to vector<8x1x132xf32>
    %40 = vector.broadcast %39 : vector<8x1x132xf32> to vector<8x16x132xf32>
    %41 = vector.broadcast %9 : vector<1x16x1xf32> to vector<8x16x132xf32>
    %42 = arith.mulf %40, %41 : vector<8x16x132xf32>
    %43 = arith.addf %37, %42 : vector<8x16x132xf32>
    %44 = vector.extract_strided_slice %0 {offsets = [0, 3], sizes = [8, 132], strides = [1, 1]} : vector<8x136xf32> to vector<8x132xf32>
    %45 = vector.shape_cast %44 : vector<8x132xf32> to vector<8x1x132xf32>
    %46 = vector.broadcast %45 : vector<8x1x132xf32> to vector<8x16x132xf32>
    %47 = vector.broadcast %11 : vector<1x16x1xf32> to vector<8x16x132xf32>
    %48 = arith.mulf %46, %47 : vector<8x16x132xf32>
    %49 = arith.addf %43, %48 : vector<8x16x132xf32>
    %50 = vector.extract_strided_slice %0 {offsets = [0, 4], sizes = [8, 132], strides = [1, 1]} : vector<8x136xf32> to vector<8x132xf32>
    %51 = vector.shape_cast %50 : vector<8x132xf32> to vector<8x1x132xf32>
    %52 = vector.broadcast %51 : vector<8x1x132xf32> to vector<8x16x132xf32>
    %53 = vector.broadcast %13 : vector<1x16x1xf32> to vector<8x16x132xf32>
    %54 = arith.mulf %52, %53 : vector<8x16x132xf32>
    %55 = arith.addf %49, %54 : vector<8x16x132xf32>
    %cst = arith.constant 0.000000e+00 : f32
    %56 = vector.broadcast %cst : f32 to vector<8x16x132xf32>
    %57 = arith.maximumf %55, %56 : vector<8x16x132xf32>
    %58 = tpu.iota {dimensions = array<i32: 2>} : vector<1x1x132xi32>
    %c2_i32 = arith.constant 2 : i32
    %59 = vector.broadcast %c2_i32 : i32 to vector<1x1x132xi32>
    %60 = arith.cmpi sge, %58, %59 : vector<1x1x132xi32>
    %c18_i32 = arith.constant 18 : i32
    %61 = vector.broadcast %c18_i32 : i32 to vector<1x1x132xi32>
    %62 = arith.cmpi slt, %58, %61 : vector<1x1x132xi32>
    %63 = arith.andi %60, %62 : vector<1x1x132xi1>
    %64 = arith.extui %63 : vector<1x1x132xi1> to vector<1x1x132xi32>
    %65 = arith.sitofp %64 : vector<1x1x132xi32> to vector<1x1x132xf32>
    %66 = vector.broadcast %65 : vector<1x1x132xf32> to vector<8x16x132xf32>
    %67 = arith.mulf %57, %66 : vector<8x16x132xf32>
    %68 = vector.extract_strided_slice %67 {offsets = [0, 0, 0], sizes = [8, 16, 128], strides = [1, 1, 1]} : vector<8x16x132xf32> to vector<8x16x128xf32>
    %69 = vector.broadcast %15 : vector<1x16x1xf32> to vector<8x16x128xf32>
    %70 = arith.mulf %68, %69 : vector<8x16x128xf32>
    %71 = vector.extract_strided_slice %67 {offsets = [0, 0, 1], sizes = [8, 16, 128], strides = [1, 1, 1]} : vector<8x16x132xf32> to vector<8x16x128xf32>
    %72 = vector.broadcast %17 : vector<1x16x1xf32> to vector<8x16x128xf32>
    %73 = arith.mulf %71, %72 : vector<8x16x128xf32>
    %74 = arith.addf %70, %73 : vector<8x16x128xf32>
    %75 = vector.extract_strided_slice %67 {offsets = [0, 0, 2], sizes = [8, 16, 128], strides = [1, 1, 1]} : vector<8x16x132xf32> to vector<8x16x128xf32>
    %76 = vector.broadcast %19 : vector<1x16x1xf32> to vector<8x16x128xf32>
    %77 = arith.mulf %75, %76 : vector<8x16x128xf32>
    %78 = arith.addf %74, %77 : vector<8x16x128xf32>
    %79 = vector.extract_strided_slice %67 {offsets = [0, 0, 3], sizes = [8, 16, 128], strides = [1, 1, 1]} : vector<8x16x132xf32> to vector<8x16x128xf32>
    %80 = vector.broadcast %21 : vector<1x16x1xf32> to vector<8x16x128xf32>
    %81 = arith.mulf %79, %80 : vector<8x16x128xf32>
    %82 = arith.addf %78, %81 : vector<8x16x128xf32>
    %83 = vector.extract_strided_slice %67 {offsets = [0, 0, 4], sizes = [8, 16, 128], strides = [1, 1, 1]} : vector<8x16x132xf32> to vector<8x16x128xf32>
    %84 = vector.broadcast %23 : vector<1x16x1xf32> to vector<8x16x128xf32>
    %85 = arith.mulf %83, %84 : vector<8x16x128xf32>
    %86 = arith.addf %82, %85 : vector<8x16x128xf32>
    %cst_7 = arith.constant dense<0.000000e+00> : vector<8x128xf32>
    %87 = vector.multi_reduction <add>, %86, %cst_7 [1] : vector<8x16x128xf32> to vector<8x128xf32>
    %c0_8 = arith.constant 0 : index
    %88 = memref.load %arg5[%c0_8] : memref<1xf32, #tpu.memory_space<smem>>
    %89 = vector.broadcast %88 : f32 to vector<8x128xf32>
    %90 = arith.addf %87, %89 : vector<8x128xf32>
    %c0_9 = arith.constant 0 : index
    %c0_10 = arith.constant 0 : index
    %91 = vector.load %arg6[%c0_9, %c0_10] : memref<8x128xf32, #tpu.memory_space<vmem>>, vector<8x128xf32>
    tpu.vector_store %arg6[%c0_9, %c0_10], %90 {strides = array<i32>} : memref<8x128xf32, #tpu.memory_space<vmem>>, vector<8x128xf32>,
    %92 = vector.extract_strided_slice %0 {offsets = [0, 4], sizes = [8, 128], strides = [1, 1]} : vector<8x136xf32> to vector<8x128xf32>
    %93 = arith.subf %92, %90 : vector<8x128xf32>
    %c0_11 = arith.constant 0 : index
    %c0_12 = arith.constant 0 : index
    %94 = vector.load %arg7[%c0_11, %c0_12] : memref<8x128xf32, #tpu.memory_space<vmem>>, vector<8x128xf32>
    tpu.vector_store %arg7[%c0_11, %c0_12], %93 {strides = array<i32>} : memref<8x128xf32, #tpu.memory_space<vmem>>, vector<8x128xf32>,
    return
  }
  func.func @transform_0(%arg0: i32) -> (i32, i32) {
    %c0_i32 = arith.constant 0 : i32
    %c0_i32_0 = arith.constant 0 : i32
    return %arg0, %c0_i32 : i32, i32
  }
  func.func @transform_1(%arg0: i32) -> (i32, i32) {
    %c0_i32 = arith.constant 0 : i32
    %c0_i32_0 = arith.constant 0 : i32
    %c0_i32_1 = arith.constant 0 : i32
    return %c0_i32, %c0_i32_0 : i32, i32
  }
  func.func @transform_2(%arg0: i32) -> (i32, i32) {
    %c0_i32 = arith.constant 0 : i32
    %c0_i32_0 = arith.constant 0 : i32
    %c0_i32_1 = arith.constant 0 : i32
    return %c0_i32, %c0_i32_0 : i32, i32
  }
  func.func @transform_3(%arg0: i32) -> (i32, i32) {
    %c0_i32 = arith.constant 0 : i32
    %c0_i32_0 = arith.constant 0 : i32
    %c0_i32_1 = arith.constant 0 : i32
    return %c0_i32, %c0_i32_0 : i32, i32
  }
  func.func @transform_4(%arg0: i32) -> i32 {
    %c0_i32 = arith.constant 0 : i32
    %c0_i32_0 = arith.constant 0 : i32
    return %c0_i32 : i32
  }
  func.func @transform_5(%arg0: i32) -> (i32, i32) {
    %c0_i32 = arith.constant 0 : i32
    %c0_i32_0 = arith.constant 0 : i32
    return %arg0, %c0_i32 : i32, i32
  }
  func.func @transform_6(%arg0: i32) -> (i32, i32) {
    %c0_i32 = arith.constant 0 : i32
    %c0_i32_0 = arith.constant 0 : i32
    return %arg0, %c0_i32 : i32, i32
  }
}

</mosaic_0001>

<bundles_post_ra>
// kernel: tpu_custom_call.1
= control target key start
LH: loop header
LB: loop body
LE: loop exit
PB: predicated region body
PF: predicated region fallthrough
CT: control target
= control target key end

     0   :  { %13 = vsyncpa [#allocation4], 0  ;;  %v4178_v2 = vmov 0   ;;  %v4176_v3 = vmov 1   ;;  %s4165_s0 = inlined_call_operand.vmem [shape: f32[8,136], index: 0, kind: input, shape index: {}]   ;;  %s4166_s1 = inlined_call_operand.vmem [shape: f32[16,5], index: 1, kind: input, shape index: {}]   ;;  %s4167_s2 = inlined_call_operand.vmem [shape: f32[16,1], index: 2, kind: input, shape index: {}]   ;;  %s4168_s3 = inlined_call_operand.vmem [shape: f32[16,5], index: 3, kind: input, shape index: {}]   ;;  %s4169_s4 = inlined_call_operand.<no memory space> [shape: f32[1], index: 4, kind: input, shape index: {}]   ;;  %s4170_s5 = inlined_call_operand.hbm [shape: f32[8,128], index: 5, kind: output, shape index: {0}]   ;;  %s4171_s6 = inlined_call_operand.hbm [shape: f32[8,128], index: 6, kind: output, shape index: {1}]  }
   0x1   :  { %v29_v0 = vld [vmem:[%s4167_s2] sm:$0xff]  ;;  %2103 = vset.pattern.permute.xlu1 %v4178_v2  ;;  %2104 = vset.pattern.permute.xlu0 %v4176_v3 }
   0x2   :  { %v2224_v1 = vld [vmem:[%s4166_s1] sm:$0xff]  ;;  %209 = vperm.xlu1 %2103, %v29_v0  }
   0x3   :  { %250 = vperm.xlu0 %2104, %v2224_v1  }
   0x4   :  { %14 = vsyncpa [#allocation6], 0  ;;  %v30_v4 = vld [vmem:[%s4167_s2 + $0x8] sm:$0xff]  ;;  %v4174_v6 = vmov 2   ;;  %v2172_v7 = vmov 1966171168   ;;  %v4173_v9 = vlaneseq }
   0x5   :  { %v2235_v5 = vld [vmem:[%s4166_s1 + $0x8] sm:$0xff]  ;;  %v38_v8 = vunpack.c.l.s4 %v2172_v7  ;;  %v25_v12 = vld [vmem:[%s4165_s0] sm:$0xff]  ;;  %s2173_s7 = smov 127   ;;  %v4172_v34 = vmov 3   ;;  %s2175_s8 = smov 126   ;;  %vm385_vm0 = vcmask 1039360  }
   0x6   :  { %214 = vperm.xlu1 %2103, %v30_v4   ;;  %v41_v11 = vshrl.u32 %v4173_v9, 7  ;;  %v26_v13 = vld [vmem:[%s4165_s0 + $0x8] sm:$0xff]  ;;  %s2177_s9 = smov 125   ;;  %s2178_s10 = smov 124   ;;  %vm602_vm1 = vcmask 1031168   ;;  %vm819_vm2 = vcmask 1022976  }
   0x7   :  { %2107 = vset.pattern.permute.xlu0 %v4174_v6  ;;  %v39_v10 = vunpack.c.0.s8 %v38_v8  ;;  %v35_v14 = vcombine.low %v25_v12, %v26_v13  ;;  %v36_v45 = vcombine.high %v25_v12, %v26_v13  ;;  %vm1036_vm3 = vcmask 1014784   ;;  %s2181_s16 = smov [#allocation3]  }
   0x8   :  { %471 = vperm.xlu0 %2107, %v2235_v5   ;;  %v2253_v17 = vsub.s32 0, %v41_v11  ;;  %v2255_v18 = vsub.s32 1, %v41_v11  ;;  %vm2030_vm7 = vcmask 1041409   ;;  %vm2032_vm8 = vcmask 1042434   ;;  %s2066_s17 = sshll.u32 %s2181_s16, 4  ;;  %s2067_s17 = int_to_ptr.vmem [resolvable:$true] %s2066_s17 }
   0x9   :  { %v2250_v15 = vsub.s32 %v39_v10, %v41_v11  ;;  %vm2034_vm9 = vcmask 1043459   ;;  %vm2036_vm10 = vcmask 1044484   ;;  %vm2038_vm11 = vcmask 1045509   ;;  %s2125_s18 = scalar_lea.vmem %s2067_s17, 128  ;;  %p2130_p1 = scmp.lt.s32.totalorder %s2067_s17, %s2067_s17 }
   0xa   :  { %2105 = vset.pattern.permute.xlu1 %v4176_v3  ;;  %vm2040_vm12 = vcmask 1046534   ;;  %vm2042_vm13 = vcmask 1047559   ;;  %p2126_p0 = scmp.ne.s32.totalorder %s2067_s17, %s2125_s18  ;;  %p2131_p2 = scmp.lt.s32.totalorder %s2125_s18, %s2125_s18 }
   0xb   :  { %254 = vperm.xlu1 %2105, %v2235_v5   ;;  %v43_v16 = vrot.slane %v35_v14, %v2250_v15  ;;  %v50_v52 = vrot.slane %v36_v45, %v2250_v15 }
   0xc   :  { %2108 = vset.pattern.permute.xlu0 %v4172_v34  ;;  %p2132_p3 = por %p2131_p2, %p2130_p1 }
   0xd   :  { %v59_v19 = vrot.slane %v43_v16, %v2250_v15  ;;  %v51_v27 = vcombine.high %v43_v16, %v43_v16  ;;  %v66_v53 = vrot.slane %v50_v52, %v2250_v15  ;;  %v52_v58 = vcombine.high %v50_v52, %v50_v52 }
   0xe   :  { %p2133_p4 = pnand %p2132_p3, %p2126_p0 }
   0xf   :  { %2106 = vset.pattern.permute.xlu1 %v4174_v6  ;;  %v2259_v20 = vrot.slane %v59_v19, %v2255_v18  ;;  %v2262_v21 = vrot.slane %v59_v19, %v2253_v17  ;;  %v73_v28 = vrot.slane %v51_v27, %v2250_v15  ;;  %v81_v37 = vcombine.high %v59_v19, %v59_v19 }
  0x10   :  { %467 = vperm.xlu1 %2106, %v2224_v1   ;;  %v2342_v56 = vrot.slane %v66_v53, %v2255_v18  ;;  %v2345_v57 = vrot.slane %v66_v53, %v2253_v17  ;;  %v80_v61 = vrot.slane %v52_v58, %v2250_v15  ;;  %v82_v10 = vcombine.high %v66_v53, %v66_v53 }
  0x11   :  { %v2284_v32 = vrot.slane %v73_v28, %v2255_v18  ;;  %v2287_v33 = vrot.slane %v73_v28, %v2253_v17  ;;  %v2304_v40 = vrot.slane %v81_v37, %v2255_v18  ;;  %v2307_v41 = vrot.slane %v81_v37, %v2253_v17 }
  0x12   :  { %v83_v44 = vcombine.high %v73_v28, %v73_v28  ;;  %4272 = vst [vmem:[#allocation12_spill] sm:$0xff] %v2342_v56  ;;  %4273 = vst [vmem:[#allocation13_spill] sm:$0xff] %v2345_v57  ;;  %v2361_v0 = vrot.slane %v80_v61, %v2255_v18  ;;  %v2364_v4 = vrot.slane %v80_v61, %v2253_v17 }
  0x13   :  { %4269 = vst [vmem:[#allocation9_spill] sm:$0xff] %v2304_v40  ;;  %v2379_v13 = vrot.slane %v82_v10, %v2255_v18  ;;  %v2382_v14 = vrot.slane %v82_v10, %v2253_v17  ;;  %v84_v19 = vcombine.high %v80_v61, %v80_v61 }
  0x14   :  { %2109 = vset.pattern.permute.xlu1 %v4172_v34  ;;  %v2322_v48 = vrot.slane %v83_v44, %v2255_v18  ;;  %v2325_v49 = vrot.slane %v83_v44, %v2253_v17  ;;  %4274 = vst [vmem:[#allocation14_spill] sm:$0xff] %v2361_v0  ;;  %4275 = vst [vmem:[#allocation15_spill] sm:$0xff] %v2364_v4 }
  0x15   :  { %4276 = vst [vmem:[#allocation16_spill] sm:$0xff] %v2379_v13  ;;  %4277 = vst [vmem:[#allocation17_spill] sm:$0xff] %v2382_v14  ;;  %v2397_v27 = vrot.slane %v84_v19, %v2255_v18  ;;  %v2400_v28 = vrot.slane %v84_v19, %v2253_v17 }
  0x16   :  { %4270 = vst [vmem:[#allocation10_spill] sm:$0xff] %v2322_v48  ;;  %4271 = vst [vmem:[#allocation11_spill] sm:$0xff] %v2325_v49 }
  0x17   :  { %4278 = vst [vmem:[#allocation18_spill] sm:$0xff] %v2397_v27  ;;  %4279 = vst [vmem:[#allocation19_spill] sm:$0xff] %v2400_v28 }
  0x7d   :  { %v2264_v22 = vpop.permute.xlu1 %209 }
  0x7e   :  { %v2266_v23 = vpop.permute.xlu0 %250 }
  0x7f   :  { %v258_v24 = vmul.f32 %v2266_v23, %v2259_v20  ;;  %v257_v25 = vmul.f32 %v2266_v23, %v2262_v21  ;;  %v262_v35 = vmul.f32 %v2266_v23, %v2284_v32  ;;  %v261_v36 = vmul.f32 %v2266_v23, %v2287_v33 }
  0x80   :  { %v266_v42 = vmul.f32 %v2266_v23, %v2304_v40  ;;  %v265_v43 = vmul.f32 %v2266_v23, %v2307_v41  ;;  %v270_v50 = vmul.f32 %v2266_v23, %v2322_v48  ;;  %v269_v51 = vmul.f32 %v2266_v23, %v2325_v49 }
  0x81   :  { %323 = vrot.lane.b32.xlu0 %v258_v24, %s2173_s7  ;;  %321 = vrot.lane.b32.xlu1 %v257_v25, %s2173_s7  ;;  %v2274_v26 = vpop.permute.xlu1 %214  ;;  %v274_v59 = vmul.f32 %v2266_v23, %v2342_v56  ;;  %v273_v60 = vmul.f32 %v2266_v23, %v2345_v57  ;;  %v278_v7 = vmul.f32 %v2266_v23, %v2361_v0 }
  0x82   :  { %v277_v8 = vmul.f32 %v2266_v23, %v2364_v4  ;;  %v282_v15 = vmul.f32 %v2266_v23, %v2379_v13  ;;  %v281_v16 = vmul.f32 %v2266_v23, %v2382_v14 }
  0x83   :  { %v2412_v18 = vpop.permute.xlu0 %471 }
  0x84   :  { %v484_v45 = vmul.f32 %v2412_v18, %v2307_v41  ;;  %v485_v52 = vmul.f32 %v2412_v18, %v2304_v40  ;;  %v489_v58 = vmul.f32 %v2412_v18, %v2322_v48  ;;  %v496_v61 = vmul.f32 %v2412_v18, %v2364_v4 }
  0x85   :  { %v497_v10 = vmul.f32 %v2412_v18, %v2361_v0 }
  0x86   :  { %v2277_v29 = vpop.permute.xlu1 %254 }
  0x87   :  { %v260_v30 = vmul.f32 %v2277_v29, %v2259_v20  ;;  %v259_v31 = vmul.f32 %v2277_v29, %v2262_v21  ;;  %v264_v38 = vmul.f32 %v2277_v29, %v2284_v32  ;;  %v263_v39 = vmul.f32 %v2277_v29, %v2287_v33 }
  0x88   :  { %v268_v46 = vmul.f32 %v2277_v29, %v2304_v40  ;;  %v267_v47 = vmul.f32 %v2277_v29, %v2307_v41  ;;  %v272_v54 = vmul.f32 %v2277_v29, %v2322_v48  ;;  %v271_v55 = vmul.f32 %v2277_v29, %v2325_v49 }
  0x89   :  { %327 = vrot.lane.b32.xlu0 %v260_v30, %s2173_s7  ;;  %325 = vrot.lane.b32.xlu1 %v259_v31, %s2173_s7  ;;  %v276_v62 = vmul.f32 %v2277_v29, %v2342_v56  ;;  %v275_v63 = vmul.f32 %v2277_v29, %v2345_v57  ;;  %v280_v11 = vmul.f32 %v2277_v29, %v2361_v0 }
  0x8a   :  { %v279_v12 = vmul.f32 %v2277_v29, %v2364_v4  ;;  %v284_v24 = vmul.f32 %v2277_v29, %v2379_v13  ;;  %v283_v25 = vmul.f32 %v2277_v29, %v2382_v14  ;;  %v286_v30 = vmul.f32 %v2266_v23, %v2397_v27 }
  0x8b   :  { %v285_v31 = vmul.f32 %v2266_v23, %v2400_v28  ;;  %v288_v17 = vmul.f32 %v2277_v29, %v2397_v27  ;;  %v476_v23 = vmul.f32 %v2412_v18, %v2262_v21 }
  0x8d   :  { %331 = vrot.lane.b32.xlu0 %v262_v35, %s2173_s7  ;;  %329 = vrot.lane.b32.xlu1 %v261_v36, %s2173_s7  ;;  %v2410_v35 = vpop.permute.xlu1 %467  ;;  %v287_v36 = vmul.f32 %v2277_v29, %v2400_v28 }
  0x8e   :  { %v474_v37 = vmul.f32 %v2410_v35, %v2262_v21  ;;  %v475_v29 = vmul.f32 %v2410_v35, %v2259_v20  ;;  %v479_v44 = vmul.f32 %v2410_v35, %v2284_v32  ;;  %v490_v53 = vmul.f32 %v2410_v35, %v2345_v57 }
  0x91   :  { %335 = vrot.lane.b32.xlu0 %v264_v38, %s2173_s7  ;;  %333 = vrot.lane.b32.xlu1 %v263_v39, %s2173_s7  ;;  %v478_v38 = vmul.f32 %v2410_v35, %v2287_v33  ;;  %v480_v39 = vmul.f32 %v2412_v18, %v2287_v33 }
  0x95   :  { %339 = vrot.lane.b32.xlu0 %v266_v42, %s2173_s7  ;;  %337 = vrot.lane.b32.xlu1 %v265_v43, %s2173_s7  ;;  %v477_v42 = vmul.f32 %v2412_v18, %v2259_v20  ;;  %v482_v43 = vmul.f32 %v2410_v35, %v2307_v41 }
  0x99   :  { %343 = vrot.lane.b32.xlu0 %v268_v46, %s2173_s7  ;;  %341 = vrot.lane.b32.xlu1 %v267_v47, %s2173_s7  ;;  %v481_v46 = vmul.f32 %v2412_v18, %v2284_v32  ;;  %v486_v47 = vmul.f32 %v2410_v35, %v2325_v49 }
  0x9d   :  { %347 = vrot.lane.b32.xlu0 %v270_v50, %s2173_s7  ;;  %345 = vrot.lane.b32.xlu1 %v269_v51, %s2173_s7  ;;  %v483_v50 = vmul.f32 %v2410_v35, %v2304_v40  ;;  %v488_v51 = vmul.f32 %v2412_v18, %v2325_v49 }
  0xa1   :  { %351 = vrot.lane.b32.xlu0 %v272_v54, %s2173_s7  ;;  %349 = vrot.lane.b32.xlu1 %v271_v55, %s2173_s7  ;;  %v487_v54 = vmul.f32 %v2410_v35, %v2322_v48  ;;  %v492_v55 = vmul.f32 %v2412_v18, %v2345_v57 }
  0xa5   :  { %355 = vrot.lane.b32.xlu0 %v274_v59, %s2173_s7  ;;  %353 = vrot.lane.b32.xlu1 %v273_v60, %s2173_s7  ;;  %v494_v59 = vmul.f32 %v2410_v35, %v2364_v4  ;;  %v491_v60 = vmul.f32 %v2410_v35, %v2342_v56 }
  0xa9   :  { %359 = vrot.lane.b32.xlu0 %v276_v62, %s2173_s7  ;;  %357 = vrot.lane.b32.xlu1 %v275_v63, %s2173_s7  ;;  %v493_v62 = vmul.f32 %v2412_v18, %v2342_v56  ;;  %v498_v63 = vmul.f32 %v2410_v35, %v2382_v14 }
  0xad   :  { %363 = vrot.lane.b32.xlu0 %v278_v7, %s2173_s7  ;;  %361 = vrot.lane.b32.xlu1 %v277_v8, %s2173_s7  ;;  %v495_v7 = vmul.f32 %v2410_v35, %v2361_v0  ;;  %v500_v8 = vmul.f32 %v2412_v18, %v2382_v14 }
  0xb1   :  { %367 = vrot.lane.b32.xlu0 %v280_v11, %s2173_s7  ;;  %365 = vrot.lane.b32.xlu1 %v279_v12, %s2173_s7 }
  0xb5   :  { %371 = vrot.lane.b32.xlu0 %v282_v15, %s2173_s7  ;;  %369 = vrot.lane.b32.xlu1 %v281_v16, %s2173_s7  ;;  %v502_v15 = vmul.f32 %v2410_v35, %v2400_v28  ;;  %v499_v16 = vmul.f32 %v2410_v35, %v2379_v13 }
  0xb9   :  { %375 = vrot.lane.b32.xlu0 %v284_v24, %s2173_s7  ;;  %373 = vrot.lane.b32.xlu1 %v283_v25, %s2173_s7  ;;  %v504_v25 = vmul.f32 %v2412_v18, %v2400_v28 }
  0xbd   :  { %379 = vrot.lane.b32.xlu0 %v286_v30, %s2173_s7  ;;  %377 = vrot.lane.b32.xlu1 %v285_v31, %s2173_s7  ;;  %v501_v30 = vmul.f32 %v2412_v18, %v2379_v13 }
  0xc1   :  { %383 = vrot.lane.b32.xlu0 %v288_v17, %s2173_s7  ;;  %381 = vrot.lane.b32.xlu1 %v287_v36, %s2173_s7  ;;  %v503_v36 = vmul.f32 %v2410_v35, %v2397_v27 }
  0xc5   :  { %542 = vrot.lane.b32.xlu0 %v476_v23, %s2175_s8  ;;  %538 = vrot.lane.b32.xlu1 %v474_v37, %s2175_s8 }
  0xc9   :  { %546 = vrot.lane.b32.xlu0 %v478_v38, %s2175_s8  ;;  %540 = vrot.lane.b32.xlu1 %v475_v29, %s2175_s8  ;;  %v505_v38 = vmul.f32 %v2412_v18, %v2397_v27 }
  0xcd   :  { %550 = vrot.lane.b32.xlu0 %v480_v39, %s2175_s8  ;;  %544 = vrot.lane.b32.xlu1 %v477_v42, %s2175_s8 }
  0xd1   :  { %554 = vrot.lane.b32.xlu0 %v482_v43, %s2175_s8  ;;  %548 = vrot.lane.b32.xlu1 %v479_v44, %s2175_s8 }
  0xd5   :  { %558 = vrot.lane.b32.xlu0 %v484_v45, %s2175_s8  ;;  %552 = vrot.lane.b32.xlu1 %v481_v46, %s2175_s8 }
  0xd9   :  { %562 = vrot.lane.b32.xlu0 %v486_v47, %s2175_s8  ;;  %556 = vrot.lane.b32.xlu1 %v483_v50, %s2175_s8 }
  0xdd   :  { %566 = vrot.lane.b32.xlu0 %v488_v51, %s2175_s8  ;;  %560 = vrot.lane.b32.xlu1 %v485_v52, %s2175_s8 }
  0xe1   :  { %570 = vrot.lane.b32.xlu0 %v490_v53, %s2175_s8  ;;  %564 = vrot.lane.b32.xlu1 %v487_v54, %s2175_s8 }
  0xe5   :  { %574 = vrot.lane.b32.xlu0 %v492_v55, %s2175_s8  ;;  %568 = vrot.lane.b32.xlu1 %v489_v58, %s2175_s8 }
  0xe9   :  { %578 = vrot.lane.b32.xlu0 %v494_v59, %s2175_s8  ;;  %572 = vrot.lane.b32.xlu1 %v491_v60, %s2175_s8 }
  0xed   :  { %582 = vrot.lane.b32.xlu0 %v496_v61, %s2175_s8  ;;  %576 = vrot.lane.b32.xlu1 %v493_v62, %s2175_s8 }
  0xf1   :  { %586 = vrot.lane.b32.xlu0 %v498_v63, %s2175_s8  ;;  %580 = vrot.lane.b32.xlu1 %v495_v7, %s2175_s8 }
  0xf3   :  { %v2498_v11 = vpop.permute.xlu0 %323  ;;  %v2500_v12 = vpop.permute.xlu1 %321 }
  0xf5   :  { %590 = vrot.lane.b32.xlu0 %v500_v8, %s2175_s8  ;;  %584 = vrot.lane.b32.xlu1 %v497_v10, %s2175_s8 }
  0xf9   :  { %594 = vrot.lane.b32.xlu0 %v502_v15, %s2175_s8  ;;  %588 = vrot.lane.b32.xlu1 %v499_v16, %s2175_s8 }
  0xfb   :  { %v2508_v19 = vpop.permute.xlu0 %327  ;;  %v2510_v24 = vpop.permute.xlu1 %325 }
  0xfd   :  { %598 = vrot.lane.b32.xlu0 %v504_v25, %s2175_s8  ;;  %592 = vrot.lane.b32.xlu1 %v501_v30, %s2175_s8 }
  0xff   :  { %v2518_v31 = vpop.permute.xlu0 %331  ;;  %v2520_v17 = vpop.permute.xlu1 %329 }
 0x101   :  { %596 = vrot.lane.b32.xlu1 %v503_v36, %s2175_s8  ;;  %684 = vperm.xlu0 %2108, %v2224_v1  }
 0x103   :  { %v2526_v23 = vpop.permute.xlu0 %335  ;;  %v2528_v37 = vpop.permute.xlu1 %333 }
 0x105   :  { %600 = vrot.lane.b32.xlu1 %v505_v38, %s2175_s8  ;;  %v4182_v38 = vmov 4  }
 0x106   :  { %2111 = vset.pattern.permute.xlu0 %v4182_v38 }
 0x107   :  { %v2533_v29 = vpop.permute.xlu0 %339  ;;  %v2535_v39 = vpop.permute.xlu1 %337 }
 0x109   :  { %688 = vperm.xlu1 %2109, %v2235_v5  }
 0x10b   :  { %v2538_v35 = vpop.permute.xlu0 %343  ;;  %v2540_v42 = vpop.permute.xlu1 %341 }
 0x10d   :  { %2110 = vset.pattern.permute.xlu1 %v4182_v38 }
 0x10f   :  { %v2542_v43 = vpop.permute.xlu0 %347  ;;  %v2544_v44 = vpop.permute.xlu1 %345 }
 0x113   :  { %v2546_v45 = vpop.permute.xlu0 %351  ;;  %v2548_v46 = vpop.permute.xlu1 %349 }
 0x117   :  { %v2550_v18 = vpop.permute.xlu0 %355  ;;  %v2552_v47 = vpop.permute.xlu1 %353 }
 0x118   :  { %4280 = vst [vmem:[#allocation20_spill] sm:$0xff] %v2550_v18 }
 0x11b   :  { %v2554_v50 = vpop.permute.xlu0 %359  ;;  %v2556_v51 = vpop.permute.xlu1 %357 }
 0x11c   :  { %4281 = vst [vmem:[#allocation21_spill] sm:$0xff] %v2554_v50  ;;  %4282 = vst [vmem:[#allocation22_spill] sm:$0xff] %v2556_v51 }
 0x11f   :  { %v2558_v52 = vpop.permute.xlu0 %363  ;;  %v2560_v53 = vpop.permute.xlu1 %361 }
 0x120   :  { %4283 = vst [vmem:[#allocation23_spill] sm:$0xff] %v2558_v52  ;;  %4284 = vst [vmem:[#allocation24_spill] sm:$0xff] %v2560_v53 }
 0x123   :  { %v2562_v54 = vpop.permute.xlu0 %367  ;;  %v2564_v55 = vpop.permute.xlu1 %365 }
 0x124   :  { %4285 = vst [vmem:[#allocation25_spill] sm:$0xff] %v2562_v54  ;;  %4286 = vst [vmem:[#allocation26_spill] sm:$0xff] %v2564_v55 }
 0x127   :  { %v2566_v58 = vpop.permute.xlu0 %371  ;;  %v2568_v59 = vpop.permute.xlu1 %369 }
 0x128   :  { %4287 = vst [vmem:[#allocation27_spill] sm:$0xff] %v2566_v58  ;;  %4288 = vst [vmem:[#allocation28_spill] sm:$0xff] %v2568_v59 }
 0x12b   :  { %v2570_v60 = vpop.permute.xlu0 %375  ;;  %v2572_v61 = vpop.permute.xlu1 %373 }
 0x12c   :  { %4289 = vst [vmem:[#allocation29_spill] sm:$0xff] %v2570_v60  ;;  %4290 = vst [vmem:[#allocation30_spill] sm:$0xff] %v2572_v61 }
 0x12f   :  { %v2574_v62 = vpop.permute.xlu0 %379  ;;  %v2576_v63 = vpop.permute.xlu1 %377 }
 0x130   :  { %4291 = vst [vmem:[#allocation31_spill] sm:$0xff] %v2574_v62  ;;  %4292 = vst [vmem:[#allocation32_spill] sm:$0xff] %v2576_v63 }
 0x133   :  { %v2578_v7 = vpop.permute.xlu0 %383  ;;  %v2580_v8 = vpop.permute.xlu1 %381 }
 0x134   :  { %4293 = vst [vmem:[#allocation33_spill] sm:$0xff] %v2578_v7  ;;  %4294 = vst [vmem:[#allocation34_spill] sm:$0xff] %v2580_v8 }
 0x137   :  { %v2582_v10 = vpop.permute.xlu0 %542  ;;  %v2584_v15 = vpop.permute.xlu1 %538 }
 0x13b   :  { %v2586_v16 = vpop.permute.xlu0 %546  ;;  %v2588_v25 = vpop.permute.xlu1 %540 }
 0x13f   :  { %v2590_v30 = vpop.permute.xlu0 %550  ;;  %v2592_v36 = vpop.permute.xlu1 %544 }
 0x143   :  { %v2596_v34 = vpop.permute.xlu0 %554  ;;  %v2598_v9 = vpop.permute.xlu1 %548 }
 0x144   :  { %4295 = vst [vmem:[#allocation35_spill] sm:$0xff] %v2596_v34 }
 0x147   :  { %v2600_v6 = vpop.permute.xlu0 %558  ;;  %v2602_v3 = vpop.permute.xlu1 %552 }
 0x148   :  { %4296 = vst [vmem:[#allocation36_spill] sm:$0xff] %v2600_v6 }
 0x14b   :  { %v2604_v2 = vpop.permute.xlu0 %562  ;;  %v2606_v8 = vpop.permute.xlu1 %556 }
 0x14c   :  { %4297 = vst [vmem:[#allocation37_spill] sm:$0xff] %v2604_v2  ;;  %4298 = vst [vmem:[#allocation38_spill] sm:$0xff] %v2606_v8 }
 0x14f   :  { %v2608_v7 = vpop.permute.xlu0 %566  ;;  %v2610_v63 = vpop.permute.xlu1 %560 }
 0x150   :  { %4299 = vst [vmem:[#allocation39_spill] sm:$0xff] %v2608_v7  ;;  %4300 = vst [vmem:[#allocation40_spill] sm:$0xff] %v2610_v63 }
 0x153   :  { %v2612_v62 = vpop.permute.xlu0 %570  ;;  %v2614_v61 = vpop.permute.xlu1 %564 }
 0x154   :  { %4301 = vst [vmem:[#allocation41_spill] sm:$0xff] %v2612_v62  ;;  %4302 = vst [vmem:[#allocation42_spill] sm:$0xff] %v2614_v61 }
 0x157   :  { %v2616_v38 = vpop.permute.xlu0 %574  ;;  %v2618_v34 = vpop.permute.xlu1 %568 }
 0x158   :  { %4303 = vst [vmem:[#allocation43_spill] sm:$0xff] %v2616_v38  ;;  %4304 = vst [vmem:[#allocation44_spill] sm:$0xff] %v2618_v34 }
 0x15b   :  { %v2620_v60 = vpop.permute.xlu0 %578  ;;  %v2622_v6 = vpop.permute.xlu1 %572 }
 0x15c   :  { %4305 = vst [vmem:[#allocation45_spill] sm:$0xff] %v2620_v60  ;;  %4306 = vst [vmem:[#allocation46_spill] sm:$0xff] %v2622_v6 }
 0x15f   :  { %v2624_v59 = vpop.permute.xlu1 %576  ;;  %v2626_v2 = vpop.permute.xlu0 %582 }
 0x160   :  { %4307 = vst [vmem:[#allocation47_spill] sm:$0xff] %v2624_v59  ;;  %4308 = vst [vmem:[#allocation48_spill] sm:$0xff] %v2626_v2 }
 0x163   :  { %v2628_v8 = vpop.permute.xlu1 %580  ;;  %v2630_v7 = vpop.permute.xlu0 %586 }
 0x164   :  { %4309 = vst [vmem:[#allocation49_spill] sm:$0xff] %v2628_v8  ;;  %4310 = vst [vmem:[#allocation50_spill] sm:$0xff] %v2630_v7 }
 0x167   :  { %v2632_v63 = vpop.permute.xlu1 %584  ;;  %v2634_v62 = vpop.permute.xlu0 %590 }
 0x168   :  { %4311 = vst [vmem:[#allocation51_spill] sm:$0xff] %v2632_v63  ;;  %4312 = vst [vmem:[#allocation52_spill] sm:$0xff] %v2634_v62 }
 0x16b   :  { %v2636_v61 = vpop.permute.xlu1 %588  ;;  %v2638_v38 = vpop.permute.xlu0 %594 }
 0x16c   :  { %4313 = vst [vmem:[#allocation53_spill] sm:$0xff] %v2636_v61  ;;  %4314 = vst [vmem:[#allocation54_spill] sm:$0xff] %v2638_v38 }
 0x16f   :  { %v2640_v34 = vpop.permute.xlu1 %592  ;;  %v2642_v60 = vpop.permute.xlu0 %598 }
 0x170   :  { %4315 = vst [vmem:[#allocation55_spill] sm:$0xff] %v2640_v34  ;;  %4316 = vst [vmem:[#allocation56_spill] sm:$0xff] %v2642_v60 }
 0x173   :  { %v2644_v6 = vpop.permute.xlu1 %596 }
 0x174   :  { %4317 = vst [vmem:[#allocation57_spill] sm:$0xff] %v2644_v6 }
 0x177   :  { %v2650_v62 = vpop.permute.xlu1 %600 }
 0x178   :  { %4318 = vst [vmem:[#allocation58_spill] sm:$0xff] %v2650_v62 }
 0x17c   :  { %v685_v59 = vpop.permute.xlu0 %684 }
 0x17d   :  { %v692_v2 = vmul.f32 %v685_v59, %v2259_v20  ;;  %v691_v8 = vmul.f32 %v685_v59, %v2262_v21  ;;  %v696_v60 = vmul.f32 %v685_v59, %v2284_v32  ;;  %v695_v6 = vmul.f32 %v685_v59, %v2287_v33 }
 0x17f   :  { %757 = vrot.lane.b32.xlu0 %v692_v2, %s2177_s9  ;;  %755 = vrot.lane.b32.xlu1 %v691_v8, %s2177_s9 }
 0x184   :  { %v689_v7 = vpop.permute.xlu1 %688 }
 0x185   :  { %v694_v38 = vmul.f32 %v689_v7, %v2259_v20  ;;  %v693_v34 = vmul.f32 %v689_v7, %v2262_v21  ;;  %v698_v2 = vmul.f32 %v689_v7, %v2284_v32  ;;  %v697_v8 = vmul.f32 %v689_v7, %v2287_v33 }
 0x187   :  { %761 = vrot.lane.b32.xlu0 %v694_v38, %s2177_s9  ;;  %759 = vrot.lane.b32.xlu1 %v693_v34, %s2177_s9  ;;  %v700_v38 = vmul.f32 %v685_v59, %v2304_v40  ;;  %v699_v34 = vmul.f32 %v685_v59, %v2307_v41 }
 0x18b   :  { %765 = vrot.lane.b32.xlu0 %v696_v60, %s2177_s9  ;;  %763 = vrot.lane.b32.xlu1 %v695_v6, %s2177_s9  ;;  %v702_v60 = vmul.f32 %v689_v7, %v2304_v40  ;;  %v701_v6 = vmul.f32 %v689_v7, %v2307_v41 }
 0x18f   :  { %769 = vrot.lane.b32.xlu0 %v698_v2, %s2177_s9  ;;  %767 = vrot.lane.b32.xlu1 %v697_v8, %s2177_s9  ;;  %v704_v2 = vmul.f32 %v685_v59, %v2322_v48  ;;  %v703_v8 = vmul.f32 %v685_v59, %v2325_v49 }
 0x193   :  { %773 = vrot.lane.b32.xlu0 %v700_v38, %s2177_s9  ;;  %771 = vrot.lane.b32.xlu1 %v699_v34, %s2177_s9  ;;  %v706_v38 = vmul.f32 %v689_v7, %v2322_v48  ;;  %v705_v34 = vmul.f32 %v689_v7, %v2325_v49 }
 0x197   :  { %777 = vrot.lane.b32.xlu0 %v702_v60, %s2177_s9  ;;  %775 = vrot.lane.b32.xlu1 %v701_v6, %s2177_s9  ;;  %v708_v60 = vmul.f32 %v685_v59, %v2342_v56  ;;  %v707_v6 = vmul.f32 %v685_v59, %v2345_v57 }
 0x19b   :  { %781 = vrot.lane.b32.xlu0 %v704_v2, %s2177_s9  ;;  %779 = vrot.lane.b32.xlu1 %v703_v8, %s2177_s9  ;;  %v710_v2 = vmul.f32 %v689_v7, %v2342_v56  ;;  %v709_v8 = vmul.f32 %v689_v7, %v2345_v57 }
 0x19f   :  { %785 = vrot.lane.b32.xlu0 %v706_v38, %s2177_s9  ;;  %783 = vrot.lane.b32.xlu1 %v705_v34, %s2177_s9  ;;  %v712_v38 = vmul.f32 %v685_v59, %v2361_v0  ;;  %v711_v34 = vmul.f32 %v685_v59, %v2364_v4 }
 0x1a3   :  { %789 = vrot.lane.b32.xlu0 %v708_v60, %s2177_s9  ;;  %787 = vrot.lane.b32.xlu1 %v707_v6, %s2177_s9  ;;  %v714_v60 = vmul.f32 %v689_v7, %v2361_v0  ;;  %v713_v6 = vmul.f32 %v689_v7, %v2364_v4 }
 0x1a7   :  { %793 = vrot.lane.b32.xlu0 %v710_v2, %s2177_s9  ;;  %791 = vrot.lane.b32.xlu1 %v709_v8, %s2177_s9  ;;  %v716_v2 = vmul.f32 %v685_v59, %v2379_v13  ;;  %v715_v8 = vmul.f32 %v685_v59, %v2382_v14 }
 0x1ab   :  { %797 = vrot.lane.b32.xlu0 %v712_v38, %s2177_s9  ;;  %795 = vrot.lane.b32.xlu1 %v711_v34, %s2177_s9  ;;  %v718_v38 = vmul.f32 %v689_v7, %v2379_v13  ;;  %v717_v34 = vmul.f32 %v689_v7, %v2382_v14 }
 0x1af   :  { %801 = vrot.lane.b32.xlu0 %v714_v60, %s2177_s9  ;;  %799 = vrot.lane.b32.xlu1 %v713_v6, %s2177_s9  ;;  %v720_v60 = vmul.f32 %v685_v59, %v2397_v27  ;;  %v719_v6 = vmul.f32 %v685_v59, %v2400_v28 }
 0x1b3   :  { %805 = vrot.lane.b32.xlu0 %v716_v2, %s2177_s9  ;;  %803 = vrot.lane.b32.xlu1 %v715_v8, %s2177_s9  ;;  %v722_v2 = vmul.f32 %v689_v7, %v2397_v27  ;;  %v721_v8 = vmul.f32 %v689_v7, %v2400_v28 }
 0x1b7   :  { %809 = vrot.lane.b32.xlu0 %v718_v38, %s2177_s9  ;;  %807 = vrot.lane.b32.xlu1 %v717_v34, %s2177_s9  ;;  %v4319_v38 = vmov 0  }
 0x1bb   :  { %813 = vrot.lane.b32.xlu0 %v720_v60, %s2177_s9  ;;  %811 = vrot.lane.b32.xlu1 %v719_v6, %s2177_s9 }
 0x1bf   :  { %817 = vrot.lane.b32.xlu0 %v722_v2, %s2177_s9  ;;  %815 = vrot.lane.b32.xlu1 %v721_v8, %s2177_s9 }
 0x1c3   :  { %905 = vperm.xlu0 %2111, %v2235_v5   ;;  %901 = vperm.xlu1 %2110, %v2224_v1  }
 0x1c7   :  { %2112 = vset.pattern.permute.xlu0 %v4319_v38  ;;  %2113 = vset.pattern.permute.xlu1 %v4319_v38 }
 0x1c8   :  { %167 = vperm.xlu0 %2112, %v2224_v1  }
 0x1cc   :  { %172 = vperm.xlu0 %2112, %v2235_v5  }
 0x1f1   :  { %v2718_v59 = vpop.permute.xlu0 %757  ;;  %v2720_v34 = vpop.permute.xlu1 %755 }
 0x1f9   :  { %v2722_v7 = vpop.permute.xlu0 %761  ;;  %v2724_v60 = vpop.permute.xlu1 %759 }
 0x1fd   :  { %v2726_v6 = vpop.permute.xlu0 %765  ;;  %v2728_v2 = vpop.permute.xlu1 %763 }
 0x201   :  { %v2730_v8 = vpop.permute.xlu0 %769  ;;  %v2732_v62 = vpop.permute.xlu1 %767 }
 0x205   :  { %v2734_v38 = vpop.permute.xlu0 %773  ;;  %v2736_v1 = vpop.permute.xlu1 %771 }
 0x206   :  { %4320 = vst [vmem:[#allocation59_spill] sm:$0xff] %v2734_v38  ;;  %4321 = vst [vmem:[#allocation60_spill] sm:$0xff] %v2736_v1 }
 0x209   :  { %v2738_v5 = vpop.permute.xlu0 %777  ;;  %v2740_v61 = vpop.permute.xlu1 %775 }
 0x20a   :  { %4322 = vst [vmem:[#allocation61_spill] sm:$0xff] %v2738_v5  ;;  %4323 = vst [vmem:[#allocation62_spill] sm:$0xff] %v2740_v61 }
 0x20d   :  { %v2742_v63 = vpop.permute.xlu0 %781  ;;  %v2744_v58 = vpop.permute.xlu1 %779 }
 0x20e   :  { %4324 = vst [vmem:[#allocation63_spill] sm:$0xff] %v2742_v63  ;;  %4325 = vst [vmem:[#allocation64_spill] sm:$0xff] %v2744_v58 }
 0x211   :  { %v2746_v55 = vpop.permute.xlu0 %785  ;;  %v2748_v54 = vpop.permute.xlu1 %783 }
 0x212   :  { %4326 = vst [vmem:[#allocation65_spill] sm:$0xff] %v2746_v55  ;;  %4327 = vst [vmem:[#allocation66_spill] sm:$0xff] %v2748_v54 }
 0x215   :  { %v2750_v53 = vpop.permute.xlu0 %789  ;;  %v2752_v52 = vpop.permute.xlu1 %787 }
 0x216   :  { %4328 = vst [vmem:[#allocation67_spill] sm:$0xff] %v2750_v53  ;;  %4329 = vst [vmem:[#allocation68_spill] sm:$0xff] %v2752_v52 }
 0x219   :  { %v2754_v51 = vpop.permute.xlu0 %793  ;;  %v2756_v38 = vpop.permute.xlu1 %791 }
 0x21a   :  { %4330 = vst [vmem:[#allocation69_spill] sm:$0xff] %v2754_v51  ;;  %4331 = vst [vmem:[#allocation70_spill] sm:$0xff] %v2756_v38 }
 0x21d   :  { %v2758_v1 = vpop.permute.xlu0 %797  ;;  %v2760_v5 = vpop.permute.xlu1 %795 }
 0x21e   :  { %4332 = vst [vmem:[#allocation71_spill] sm:$0xff] %v2758_v1  ;;  %4333 = vst [vmem:[#allocation72_spill] sm:$0xff] %v2760_v5 }
 0x221   :  { %v2762_v61 = vpop.permute.xlu0 %801  ;;  %v2764_v63 = vpop.permute.xlu1 %799 }
 0x222   :  { %4334 = vst [vmem:[#allocation73_spill] sm:$0xff] %v2762_v61  ;;  %4335 = vst [vmem:[#allocation74_spill] sm:$0xff] %v2764_v63 }
 0x225   :  { %v2766_v58 = vpop.permute.xlu0 %805  ;;  %v2768_v55 = vpop.permute.xlu1 %803 }
 0x226   :  { %4336 = vst [vmem:[#allocation75_spill] sm:$0xff] %v2766_v58  ;;  %4337 = vst [vmem:[#allocation76_spill] sm:$0xff] %v2768_v55 }
 0x229   :  { %v2770_v54 = vpop.permute.xlu0 %809  ;;  %v2772_v53 = vpop.permute.xlu1 %807 }
 0x22a   :  { %4338 = vst [vmem:[#allocation77_spill] sm:$0xff] %v2770_v54  ;;  %4339 = vst [vmem:[#allocation78_spill] sm:$0xff] %v2772_v53 }
 0x22d   :  { %v2774_v52 = vpop.permute.xlu0 %813  ;;  %v2776_v51 = vpop.permute.xlu1 %811 }
 0x22e   :  { %4340 = vst [vmem:[#allocation79_spill] sm:$0xff] %v2774_v52  ;;  %4341 = vst [vmem:[#allocation80_spill] sm:$0xff] %v2776_v51 }
 0x231   :  { %v2778_v38 = vpop.permute.xlu0 %817  ;;  %v2780_v1 = vpop.permute.xlu1 %815 }
 0x232   :  { %4342 = vst [vmem:[#allocation81_spill] sm:$0xff] %v2778_v38  ;;  %4343 = vst [vmem:[#allocation82_spill] sm:$0xff] %v2780_v1 }
 0x23e   :  { %v2782_v5 = vpop.permute.xlu0 %905  ;;  %v2784_v61 = vpop.permute.xlu1 %901 }
 0x23f   :  { %v910_v58 = vmul.f32 %v2782_v5, %v2262_v21  ;;  %v908_v54 = vmul.f32 %v2784_v61, %v2262_v21  ;;  %v912_v38 = vmul.f32 %v2784_v61, %v2287_v33  ;;  %v909_v1 = vmul.f32 %v2784_v61, %v2259_v20 }
 0x240   :  { %v914_v51 = vmul.f32 %v2782_v5, %v2287_v33  ;;  %v911_v52 = vmul.f32 %v2782_v5, %v2259_v20 }
 0x241   :  { %976 = vrot.lane.b32.xlu0 %v910_v58, %s2178_s10  ;;  %972 = vrot.lane.b32.xlu1 %v908_v54, %s2178_s10  ;;  %v916_v54 = vmul.f32 %v2784_v61, %v2307_v41  ;;  %v913_v58 = vmul.f32 %v2784_v61, %v2284_v32 }
 0x245   :  { %980 = vrot.lane.b32.xlu0 %v912_v38, %s2178_s10  ;;  %974 = vrot.lane.b32.xlu1 %v909_v1, %s2178_s10  ;;  %v918_v38 = vmul.f32 %v2782_v5, %v2307_v41  ;;  %v915_v1 = vmul.f32 %v2782_v5, %v2284_v32 }
 0x249   :  { %984 = vrot.lane.b32.xlu0 %v914_v51, %s2178_s10  ;;  %978 = vrot.lane.b32.xlu1 %v911_v52, %s2178_s10  ;;  %v920_v51 = vmul.f32 %v2784_v61, %v2325_v49  ;;  %v917_v52 = vmul.f32 %v2784_v61, %v2304_v40 }
 0x24d   :  { %988 = vrot.lane.b32.xlu0 %v916_v54, %s2178_s10  ;;  %982 = vrot.lane.b32.xlu1 %v913_v58, %s2178_s10  ;;  %v922_v54 = vmul.f32 %v2782_v5, %v2325_v49  ;;  %v919_v58 = vmul.f32 %v2782_v5, %v2304_v40 }
 0x251   :  { %992 = vrot.lane.b32.xlu0 %v918_v38, %s2178_s10  ;;  %986 = vrot.lane.b32.xlu1 %v915_v1, %s2178_s10  ;;  %v924_v38 = vmul.f32 %v2784_v61, %v2345_v57  ;;  %v921_v1 = vmul.f32 %v2784_v61, %v2322_v48 }
 0x255   :  { %996 = vrot.lane.b32.xlu0 %v920_v51, %s2178_s10  ;;  %990 = vrot.lane.b32.xlu1 %v917_v52, %s2178_s10  ;;  %v926_v51 = vmul.f32 %v2782_v5, %v2345_v57  ;;  %v923_v52 = vmul.f32 %v2782_v5, %v2322_v48 }
 0x259   :  { %1000 = vrot.lane.b32.xlu0 %v922_v54, %s2178_s10  ;;  %994 = vrot.lane.b32.xlu1 %v919_v58, %s2178_s10  ;;  %v928_v54 = vmul.f32 %v2784_v61, %v2364_v4  ;;  %v925_v58 = vmul.f32 %v2784_v61, %v2342_v56 }
 0x25d   :  { %1004 = vrot.lane.b32.xlu0 %v924_v38, %s2178_s10  ;;  %998 = vrot.lane.b32.xlu1 %v921_v1, %s2178_s10  ;;  %v930_v38 = vmul.f32 %v2782_v5, %v2364_v4  ;;  %v927_v1 = vmul.f32 %v2782_v5, %v2342_v56 }
 0x261   :  { %1008 = vrot.lane.b32.xlu0 %v926_v51, %s2178_s10  ;;  %1002 = vrot.lane.b32.xlu1 %v923_v52, %s2178_s10  ;;  %v932_v51 = vmul.f32 %v2784_v61, %v2382_v14  ;;  %v929_v52 = vmul.f32 %v2784_v61, %v2361_v0 }
 0x265   :  { %1012 = vrot.lane.b32.xlu0 %v928_v54, %s2178_s10  ;;  %1006 = vrot.lane.b32.xlu1 %v925_v58, %s2178_s10  ;;  %v934_v54 = vmul.f32 %v2782_v5, %v2382_v14  ;;  %v931_v58 = vmul.f32 %v2782_v5, %v2361_v0 }
 0x269   :  { %1016 = vrot.lane.b32.xlu0 %v930_v38, %s2178_s10  ;;  %1010 = vrot.lane.b32.xlu1 %v927_v1, %s2178_s10  ;;  %v936_v38 = vmul.f32 %v2784_v61, %v2400_v28  ;;  %v933_v1 = vmul.f32 %v2784_v61, %v2379_v13 }
 0x26d   :  { %1020 = vrot.lane.b32.xlu0 %v932_v51, %s2178_s10  ;;  %1014 = vrot.lane.b32.xlu1 %v929_v52, %s2178_s10  ;;  %v938_v51 = vmul.f32 %v2782_v5, %v2400_v28  ;;  %v935_v52 = vmul.f32 %v2782_v5, %v2379_v13 }
 0x271   :  { %1024 = vrot.lane.b32.xlu0 %v934_v54, %s2178_s10  ;;  %1018 = vrot.lane.b32.xlu1 %v931_v58, %s2178_s10  ;;  %v2879_v54 = vld [vmem:[%s4168_s3] sm:$0xff]  ;;  %v937_v58 = vmul.f32 %v2784_v61, %v2397_v27  ;;  %v4347_v61 = vmov 2  }
 0x272   :  { %4344 = vst [vmem:[#allocation83_spill] sm:$0xff] %v2879_v54 }
 0x275   :  { %1028 = vrot.lane.b32.xlu0 %v936_v38, %s2178_s10  ;;  %1022 = vrot.lane.b32.xlu1 %v933_v1, %s2178_s10  ;;  %v939_v38 = vmul.f32 %v2782_v5, %v2397_v27  ;;  %v2890_v1 = vld [vmem:[%s4168_s3 + $0x8] sm:$0xff]  ;;  %v2900_v5 = vpop.permute.xlu0 %167 }
 0x276   :  { %4345 = vst [vmem:[#allocation84_spill] sm:$0xff] %v2890_v1 }
 0x279   :  { %1032 = vrot.lane.b32.xlu0 %v938_v51, %s2178_s10  ;;  %1026 = vrot.lane.b32.xlu1 %v935_v52, %s2178_s10  ;;  %v4346_v51 = vmov 1   ;;  %v2902_v52 = vpop.permute.xlu0 %172 }
 0x27d   :  { %1196 = vperm.xlu0 %2112, %v2879_v54   ;;  %1030 = vrot.lane.b32.xlu1 %v937_v58, %s2178_s10 }
 0x281   :  { %2115 = vset.pattern.permute.xlu0 %v4346_v51  ;;  %1034 = vrot.lane.b32.xlu1 %v939_v38, %s2178_s10 }
 0x282   :  { %1225 = vperm.xlu0 %2115, %v2890_v1  }
 0x285   :  { %1201 = vperm.xlu1 %2113, %v2890_v1  }
 0x286   :  { %2117 = vset.pattern.permute.xlu0 %v4347_v61 }
 0x289   :  { %2114 = vset.pattern.permute.xlu1 %v4346_v51 }
 0x28a   :  { %1221 = vperm.xlu1 %2114, %v2879_v54  }
 0x28e   :  { %2116 = vset.pattern.permute.xlu1 %v4347_v61 }
 0x2b3   :  { %v977_v58 = vpop.permute.xlu0 %976  ;;  %v2904_v27 = vpop.permute.xlu1 %972 }
 0x2b7   :  { %v2906_v38 = vpop.permute.xlu0 %980  ;;  %v2908_v28 = vpop.permute.xlu1 %974 }
 0x2bb   :  { %v2910_v13 = vpop.permute.xlu0 %984  ;;  %v2912_v53 = vpop.permute.xlu1 %978 }
 0x2bf   :  { %v2914_v51 = vpop.permute.xlu0 %988  ;;  %v2916_v0 = vpop.permute.xlu1 %982 }
 0x2c0   :  { %4348 = vst [vmem:[#allocation85_spill] sm:$0xff] %v2914_v51 }
 0x2c3   :  { %v2918_v61 = vpop.permute.xlu0 %992  ;;  %v2920_v56 = vpop.permute.xlu1 %986 }
 0x2c4   :  { %4349 = vst [vmem:[#allocation86_spill] sm:$0xff] %v2918_v61 }
 0x2c7   :  { %v2922_v14 = vpop.permute.xlu0 %996  ;;  %v2924_v55 = vpop.permute.xlu1 %990 }
 0x2c8   :  { %4350 = vst [vmem:[#allocation87_spill] sm:$0xff] %v2922_v14  ;;  %4351 = vst [vmem:[#allocation88_spill] sm:$0xff] %v2924_v55 }
 0x2cb   :  { %v2926_v63 = vpop.permute.xlu0 %1000  ;;  %v2928_v54 = vpop.permute.xlu1 %994 }
 0x2cc   :  { %4352 = vst [vmem:[#allocation89_spill] sm:$0xff] %v2926_v63  ;;  %4353 = vst [vmem:[#allocation90_spill] sm:$0xff] %v2928_v54  ;;  %v177_v63 = vmul.f32 %v2902_v52, %v2262_v21 }
 0x2cf   :  { %v2930_v48 = vpop.permute.xlu0 %1004  ;;  %v2932_v4 = vpop.permute.xlu1 %998 }
 0x2d0   :  { %4354 = vst [vmem:[#allocation91_spill] sm:$0xff] %v2930_v48  ;;  %4355 = vst [vmem:[#allocation92_spill] sm:$0xff] %v2932_v4 }
 0x2d3   :  { %v2934_v1 = vpop.permute.xlu0 %1008  ;;  %v2936_v40 = vpop.permute.xlu1 %1002 }
 0x2d4   :  { %4356 = vst [vmem:[#allocation93_spill] sm:$0xff] %v2934_v1  ;;  %4357 = vst [vmem:[#allocation94_spill] sm:$0xff] %v2936_v40  ;;  %v219_v1 = vadd.f32 %v2274_v26, %v177_v63  ;;  %v604_v63 = vsel %vm602_vm1, %v2582_v10, %v2592_v36  ;;  %v388_v10 = vsel %vm385_vm0, %v2520_v17, %v2518_v31 }
 0x2d7   :  { %v2938_v57 = vpop.permute.xlu0 %1012  ;;  %v2940_v61 = vpop.permute.xlu1 %1006 }
 0x2d8   :  { %4358 = vst [vmem:[#allocation95_spill] sm:$0xff] %v2938_v57  ;;  %4359 = vst [vmem:[#allocation96_spill] sm:$0xff] %v2940_v61  ;;  %v387_v57 = vsel %vm385_vm0, %v2510_v24, %v2508_v19 }
 0x2db   :  { %v2942_v51 = vpop.permute.xlu1 %1010  ;;  %v2944_v14 = vpop.permute.xlu0 %1016 }
 0x2dc   :  { %4360 = vst [vmem:[#allocation97_spill] sm:$0xff] %v2942_v51  ;;  %4361 = vst [vmem:[#allocation98_spill] sm:$0xff] %v2944_v14  ;;  %v175_v14 = vmul.f32 %v2900_v5, %v2262_v21  ;;  %v179_v51 = vmul.f32 %v2900_v5, %v2287_v33  ;;  %v181_v21 = vmul.f32 %v2902_v52, %v2287_v33 }
 0x2de   :  { %v223_v49 = vadd.f32 %v2274_v26, %v181_v21 }
 0x2df   :  { %v2946_v55 = vpop.permute.xlu1 %1014  ;;  %v2950_v48 = vpop.permute.xlu0 %1020 }
 0x2e0   :  { %4362 = vst [vmem:[#allocation99_spill] sm:$0xff] %v2946_v55  ;;  %4363 = vst [vmem:[#allocation100_spill] sm:$0xff] %v2950_v48  ;;  %v436_v55 = vadd.f32 %v387_v57, %v219_v1  ;;  %v217_v48 = vadd.f32 %v2264_v22, %v175_v14  ;;  %v386_v1 = vsel %vm385_vm0, %v2500_v12, %v2498_v11 }
 0x2e1   :  { %v821_v14 = vsel %vm819_vm2, %v2724_v60, %v2722_v7  ;;  %v1038_v12 = vsel %vm1036_vm3, %v977_v58, %v2912_v53  ;;  %v389_v60 = vsel %vm385_vm0, %v2528_v37, %v2526_v23 }
 0x2e2   :  { %v653_v24 = vadd.f32 %v604_v63, %v436_v55  ;;  %v440_v21 = vadd.f32 %v389_v60, %v223_v49 }
 0x2e3   :  { %v2952_v4 = vpop.permute.xlu1 %1018  ;;  %v2955_v40 = vpop.permute.xlu0 %1024 }
 0x2e4   :  { %4364 = vst [vmem:[#allocation101_spill] sm:$0xff] %v2952_v4  ;;  %4365 = vst [vmem:[#allocation102_spill] sm:$0xff] %v2955_v40  ;;  %v176_v40 = vmul.f32 %v2900_v5, %v2259_v20  ;;  %v221_v4 = vadd.f32 %v2264_v22, %v179_v51  ;;  %v4369_v51 = vlaneseq  ;;  %v870_v54 = vadd.f32 %v821_v14, %v653_v24 }
 0x2e6   :  { %v218_v33 = vadd.f32 %v2264_v22, %v176_v40  ;;  %v1150_v63 = vand.u32 127, %v4369_v51  ;;  %v438_v17 = vadd.f32 %v388_v10, %v221_v4  ;;  %v603_v40 = vsel %vm602_vm1, %v2584_v15, %v2588_v25 }
 0x2e7   :  { %v2964_v61 = vpop.permute.xlu1 %1022  ;;  %v2975_v57 = vpop.permute.xlu0 %1028  ;;  %v1087_v51 = vadd.f32 %v1038_v12, %v870_v54  ;;  %v180_v4 = vmul.f32 %v2900_v5, %v2284_v32  ;;  %v822_v54 = vsel %vm819_vm2, %v2728_v2, %v2726_v6 }
 0x2e8   :  { %4366 = vst [vmem:[#allocation103_spill] sm:$0xff] %v2964_v61  ;;  %4367 = vst [vmem:[#allocation104_spill] sm:$0xff] %v2975_v57  ;;  %v178_v57 = vmul.f32 %v2902_v52, %v2259_v20  ;;  %v434_v61 = vadd.f32 %v386_v1, %v217_v48  ;;  %v605_v20 = vsel %vm602_vm1, %v2586_v16, %v2598_v9  ;;  %vm1152_vm4 = vcmp.ge.s32.totalorder %v1150_v63, 2 }
 0x2e9   :  { %v435_v48 = vadd.f32 %v2498_v11, %v218_v33  ;;  %vm1154_vm5 = vcmp.lt.s32.totalorder %v1150_v63, 18  ;;  %v655_v24 = vadd.f32 %v605_v20, %v438_v17  ;;  %v606_v16 = vsel %vm602_vm1, %v2590_v30, %v2602_v3 }
 0x2ea   :  { %v651_v58 = vadd.f32 %v603_v40, %v434_v61  ;;  %v220_v37 = vadd.f32 %v2274_v26, %v178_v57  ;;  %v820_v11 = vsel %vm819_vm2, %v2720_v34, %v2718_v59  ;;  %vm1156_vm6 = vmand %vm1152_vm4, %vm1154_vm5  ;;  %v1119_v61 = vmax.f32 %v1087_v51, 0.0 }
 0x2eb   :  { %v2986_v55 = vpop.permute.xlu1 %1026  ;;  %v652_v49 = vadd.f32 %v2588_v25, %v435_v48  ;;  %v1037_v57 = vsel %vm1036_vm3, %v2904_v27, %v2908_v28  ;;  %v222_v30 = vadd.f32 %v2264_v22, %v180_v4  ;;  %v1039_v34 = vsel %vm1036_vm3, %v2906_v38, %v2916_v0 }
 0x2ec   :  { %4368 = vst [vmem:[#allocation105_spill] sm:$0xff] %v2986_v55  ;;  %v3004_v55 = vpop.permute.xlu0 %1032  ;;  %v868_v10 = vadd.f32 %v820_v11, %v651_v58  ;;  %v437_v14 = vadd.f32 %v2508_v19, %v220_v37  ;;  %v872_v2 = vadd.f32 %v822_v54, %v655_v24  ;;  %v657_v33 = vadd.f32 %v606_v16, %v440_v21  ;;  %v4377_v54 = vld [vmem:[#allocation23_spill] sm:$0xff] }
 0x2ed   :  { %4370 = vst [vmem:[#allocation106_spill] sm:$0xff] %v3004_v55  ;;  %v2179_v63 = vmov 0.0   ;;  %v183_v25 = vmul.f32 %v2900_v5, %v2307_v41  ;;  %v390_v38 = vsel %vm385_vm0, %v2535_v39, %v2533_v29  ;;  %v823_v19 = vsel %vm819_vm2, %v2732_v62, %v2730_v8  ;;  %v4398_v55 = vld [vmem:[#allocation46_spill] sm:$0xff] }
 0x2ee   :  { %v3032_v12 = vsel %vm1156_vm6, 1.0, %v2179_v63  ;;  %v1085_v17 = vadd.f32 %v1037_v57, %v868_v10  ;;  %v1089_v60 = vadd.f32 %v1039_v34, %v872_v2  ;;  %v869_v20 = vadd.f32 %v2718_v59, %v652_v49  ;;  %v4379_v57 = vld [vmem:[#allocation25_spill] sm:$0xff]  ;;  %v4381_v10 = vld [vmem:[#allocation11_spill] sm:$0xff] }
 0x2ef   :  { %v3010_v15 = vpop.permute.xlu1 %1030  ;;  %v3037_v27 = vmul.f32 %v3032_v12, %v1119_v61  ;;  %v1040_v51 = vsel %vm1036_vm3, %v2910_v13, %v2920_v56  ;;  %v654_v4 = vadd.f32 %v2592_v36, %v437_v14  ;;  %v439_v58 = vadd.f32 %v2518_v31, %v222_v30  ;;  %v4378_v61 = vld [vmem:[#allocation24_spill] sm:$0xff]  ;;  %v4380_v30 = vld [vmem:[#allocation26_spill] sm:$0xff]  ;;  %v4382_v2 = vld [vmem:[#allocation27_spill] sm:$0xff] }
 0x2f0   :  { %4371 = vst [vmem:[#allocation107_spill] sm:$0xff] %v3010_v15  ;;  %v874_v37 = vadd.f32 %v823_v19, %v657_v33  ;;  %v391_v62 = vsel %vm385_vm0, %v2540_v42, %v2538_v35  ;;  %v1086_v59 = vadd.f32 %v2908_v28, %v869_v20  ;;  %v225_v24 = vadd.f32 %v2264_v22, %v183_v25  ;;  %v4376_v42 = vld [vmem:[#allocation22_spill] sm:$0xff]  ;;  %v4383_v33 = vld [vmem:[#allocation28_spill] sm:$0xff] }
 0x2f1   :  { %4373 = vst [vmem:[#allocation109_spill] sm:$0xff] %v3037_v27  ;;  %v185_v13 = vmul.f32 %v2902_v52, %v2307_v41  ;;  %v392_v36 = vsel %vm385_vm0, %v2544_v44, %v2542_v43  ;;  %v1117_v31 = vmax.f32 %v1085_v17, 0.0  ;;  %v1121_v21 = vmax.f32 %v1089_v60, 0.0 }
 0x2f2   :  { %v1091_v16 = vadd.f32 %v1040_v51, %v874_v37  ;;  %v3073_v28 = vsel %vm385_vm0, %v2548_v46, %v2546_v45  ;;  %v3078_v41 = vsel %vm385_vm0, %v2552_v47, %v2550_v18  ;;  %v3083_v44 = vsel %vm385_vm0, %v4376_v42, %v2554_v50  ;;  %v4386_v51 = vld [vmem:[#allocation29_spill] sm:$0xff]  ;;  %v4388_v37 = vld [vmem:[#allocation38_spill] sm:$0xff]  ;;  %v4427_v50 = vld [vmem:[#allocation84_spill] sm:$0xff] }
 0x2f3   :  { %v3039_v40 = vpop.permute.xlu1 %1034  ;;  %v3088_v49 = vsel %vm385_vm0, %v4378_v61, %v4377_v54  ;;  %v3093_v46 = vsel %vm385_vm0, %v4380_v30, %v4379_v57  ;;  %v871_v34 = vadd.f32 %v2722_v7, %v654_v4  ;;  %v656_v47 = vadd.f32 %v2598_v9, %v439_v58  ;;  %v4387_v4 = vld [vmem:[#allocation30_spill] sm:$0xff]  ;;  %v4393_v42 = vld [vmem:[#allocation37_spill] sm:$0xff] }
 0x2f4   :  { %4374 = vst [vmem:[#allocation110_spill] sm:$0xff] %v3039_v40  ;;  %v187_v14 = vmul.f32 %v2900_v5, %v4381_v10  ;;  %v3102_v63 = vsel %vm385_vm0, %v4383_v33, %v4382_v2  ;;  %v1118_v25 = vmax.f32 %v1086_v59, 0.0  ;;  %v442_v17 = vadd.f32 %v390_v38, %v225_v24  ;;  %v4390_v59 = vld [vmem:[#allocation40_spill] sm:$0xff]  ;;  %v4399_v40 = vld [vmem:[#allocation41_spill] sm:$0xff]  ;;  %v4409_v2 = vld [vmem:[#allocation51_spill] sm:$0xff] }
 0x2f5   :  { %v227_v60 = vadd.f32 %v2274_v26, %v185_v13  ;;  %v3106_v19 = vmul.f32 %v3032_v12, %v1117_v31  ;;  %v1088_v20 = vadd.f32 %v2912_v53, %v871_v34  ;;  %v3110_v7 = vmul.f32 %v3032_v12, %v1121_v21  ;;  %v4391_v24 = vld [vmem:[#allocation36_spill] sm:$0xff]  ;;  %v4392_v31 = vld [vmem:[#allocation42_spill] sm:$0xff]  ;;  %v4433_v18 = vld [vmem:[#allocation69_spill] sm:$0xff] }
 0x2f6   :  { %v1123_v9 = vmax.f32 %v1091_v16, 0.0  ;;  %v3115_v58 = vsel %vm385_vm0, %v4387_v4, %v4386_v51  ;;  %v608_v13 = vsel %vm602_vm1, %v4391_v24, %v4390_v59  ;;  %v609_v53 = vsel %vm602_vm1, %v4393_v42, %v4392_v31  ;;  %v4394_v33 = vld [vmem:[#allocation44_spill] sm:$0xff]  ;;  %v4395_v4 = vld [vmem:[#allocation39_spill] sm:$0xff] }
 0x2f7   :  { %4384 = vst [vmem:[#allocation22_spill] sm:$0xff] %v3106_v19  ;;  %4385 = vst [vmem:[#allocation24_spill] sm:$0xff] %v3110_v7  ;;  %v873_v16 = vadd.f32 %v2726_v6, %v656_v47  ;;  %v229_v61 = vadd.f32 %v2264_v22, %v187_v14  ;;  %v189_v42 = vmul.f32 %v2902_v52, %v4381_v10  ;;  %v1120_v6 = vmax.f32 %v1088_v20, 0.0  ;;  %v4403_v20 = vld [vmem:[#allocation45_spill] sm:$0xff] }
 0x2f8   :  { %v3021_v1 = vpop.permute.xlu0 %1196  ;;  %v3143_v14 = vmul.f32 %v3032_v12, %v1123_v9  ;;  %v4404_v9 = vld [vmem:[#allocation59_spill] sm:$0xff] }
 0x2f9   :  { %4372 = vst [vmem:[#allocation108_spill] sm:$0xff] %v3021_v1  ;;  %v444_v1 = vadd.f32 %v391_v62, %v227_v60  ;;  %v1090_v47 = vadd.f32 %v2916_v0, %v873_v16  ;;  %v4400_v62 = vld [vmem:[#allocation47_spill] sm:$0xff] }
 0x2fa   :  { %4397 = vst [vmem:[#allocation11_spill] sm:$0xff] %v3143_v14  ;;  %v4401_v60 = vld [vmem:[#allocation43_spill] sm:$0xff] }
 0x2fb   :  { %v3155_v10 = vsel %vm602_vm1, %v4401_v60, %v4400_v62 }
 0x2fd   :  { %v3051_v48 = vpop.permute.xlu0 %1225 }
 0x2fe   :  { %v1230_v39 = vmul.f32 %v3051_v48, %v3037_v27  ;;  %v1234_v15 = vmul.f32 %v3051_v48, %v3143_v14  ;;  %v4408_v27 = vld [vmem:[#allocation13_spill] sm:$0xff]  ;;  %v4418_v14 = vld [vmem:[#allocation62_spill] sm:$0xff] }
 0x300   :  { %1296 = vrot.lane.b32.xlu0 %v1230_v39, %s2173_s7  ;;  %v3068_v11 = vpop.permute.xlu1 %1201  ;;  %v4389_v39 = vld [vmem:[#allocation35_spill] sm:$0xff] }
 0x301   :  { %4375 = vst [vmem:[#allocation111_spill] sm:$0xff] %v3068_v11  ;;  %v607_v38 = vsel %vm602_vm1, %v4389_v39, %v4388_v37  ;;  %v610_v39 = vsel %vm602_vm1, %v4395_v4, %v4394_v33  ;;  %v3139_v11 = vmul.f32 0.0, %v1118_v25  ;;  %v4402_v25 = vld [vmem:[#allocation49_spill] sm:$0xff]  ;;  %v4434_v33 = vld [vmem:[#allocation70_spill] sm:$0xff] }
 0x302   :  { %v659_v24 = vadd.f32 %v607_v38, %v442_v17  ;;  %v3150_v17 = vsel %vm602_vm1, %v4399_v40, %v4398_v55  ;;  %v3160_v0 = vsel %vm602_vm1, %v4403_v20, %v4402_v25  ;;  %v4405_v38 = vld [vmem:[#allocation60_spill] sm:$0xff]  ;;  %v446_v40 = vadd.f32 %v392_v36, %v229_v61  ;;  %v4422_v25 = vld [vmem:[#allocation86_spill] sm:$0xff] }
 0x303   :  { %4396 = vst [vmem:[#allocation26_spill] sm:$0xff] %v3139_v11  ;;  %v824_v16 = vsel %vm819_vm2, %v4405_v38, %v4404_v9  ;;  %v231_v20 = vadd.f32 %v2274_v26, %v189_v42  ;;  %v4410_v38 = vld [vmem:[#allocation48_spill] sm:$0xff]  ;;  %v1122_v36 = vmax.f32 %v1090_v47, 0.0  ;;  %v182_v61 = vmul.f32 %v2902_v52, %v2284_v32  ;;  %v4414_v42 = vld [vmem:[#allocation55_spill] sm:$0xff] }
 0x304   :  { %v876_v51 = vadd.f32 %v824_v16, %v659_v24  ;;  %v3178_v57 = vsel %vm602_vm1, %v4410_v38, %v4409_v2  ;;  %v4415_v16 = vld [vmem:[#allocation52_spill] sm:$0xff]  ;;  %v4419_v32 = vld [vmem:[#allocation63_spill] sm:$0xff] }
 0x305   :  { %v3126_v21 = vpop.permute.xlu1 %1221  ;;  %v3194_v38 = vsel %vm602_vm1, %v4415_v16, %v4414_v42  ;;  %v4420_v2 = vld [vmem:[#allocation64_spill] sm:$0xff]  ;;  %v448_v62 = vadd.f32 %v3073_v28, %v231_v20  ;;  %v3214_v55 = vmul.f32 0.0, %v1122_v36 }
 0x306   :  { %v1232_v30 = vmul.f32 %v3126_v21, %v3110_v7  ;;  %v1228_v34 = vmul.f32 %v3126_v21, %v3106_v19  ;;  %v1229_v60 = vmul.f32 %v3126_v21, %v3139_v11  ;;  %v661_v7 = vadd.f32 %v608_v13, %v444_v1  ;;  %v4412_v1 = vld [vmem:[#allocation53_spill] sm:$0xff]  ;;  %v4413_v13 = vld [vmem:[#allocation50_spill] sm:$0xff]  ;;  %4416 = vst [vmem:[#allocation30_spill] sm:$0xff] %v3194_v38  ;;  %v4430_v36 = vld [vmem:[#allocation92_spill] sm:$0xff] }
 0x307   :  { %v191_v19 = vmul.f32 %v2900_v5, %v4408_v27  ;;  %v3189_v24 = vsel %vm602_vm1, %v4413_v13, %v4412_v1  ;;  %v193_v13 = vmul.f32 %v2902_v52, %v4408_v27  ;;  %v663_v1 = vadd.f32 %v609_v53, %v446_v40  ;;  %4425 = vst [vmem:[#allocation38_spill] sm:$0xff] %v3214_v55  ;;  %v4426_v38 = vld [vmem:[#allocation9_spill] sm:$0xff]  ;;  %v4429_v53 = vld [vmem:[#allocation68_spill] sm:$0xff] }
 0x308   :  { %1300 = vrot.lane.b32.xlu0 %v1232_v30, %s2173_s7  ;;  %1292 = vrot.lane.b32.xlu1 %v1228_v34, %s2173_s7  ;;  %v4406_v30 = vld [vmem:[#allocation88_spill] sm:$0xff]  ;;  %v4407_v34 = vld [vmem:[#allocation85_spill] sm:$0xff]  ;;  %v184_v27 = vmul.f32 %v2900_v5, %v4426_v38  ;;  %v186_v40 = vmul.f32 %v2902_v52, %v4426_v38 }
 0x309   :  { %v1041_v4 = vsel %vm1036_vm3, %v4407_v34, %v4406_v30  ;;  %v3180_v34 = vmul.f32 0.0, %v1120_v6  ;;  %v4417_v6 = vld [vmem:[#allocation61_spill] sm:$0xff] }
 0x30a   :  { %v825_v47 = vsel %vm819_vm2, %v4418_v14, %v4417_v6  ;;  %v1093_v11 = vadd.f32 %v1041_v4, %v876_v51  ;;  %v233_v51 = vadd.f32 %v2264_v22, %v191_v19  ;;  %v4423_v14 = vld [vmem:[#allocation65_spill] sm:$0xff]  ;;  %v4424_v4 = vld [vmem:[#allocation66_spill] sm:$0xff]  ;;  %v226_v38 = vadd.f32 %v2264_v22, %v184_v27 }
 0x30b   :  { %4411 = vst [vmem:[#allocation28_spill] sm:$0xff] %v3180_v34  ;;  %v1231_v16 = vmul.f32 %v3051_v48, %v3180_v34  ;;  %v878_v42 = vadd.f32 %v825_v47, %v661_v7  ;;  %v4428_v7 = vld [vmem:[#allocation67_spill] sm:$0xff] }
 0x30c   :  { %1304 = vrot.lane.b32.xlu0 %v1234_v15, %s2173_s7  ;;  %1294 = vrot.lane.b32.xlu1 %v1229_v60, %s2173_s7  ;;  %v826_v15 = vsel %vm819_vm2, %v4420_v2, %v4419_v32  ;;  %v4421_v60 = vld [vmem:[#allocation90_spill] sm:$0xff]  ;;  %v827_v2 = vsel %vm819_vm2, %v4424_v4, %v4423_v14  ;;  %v828_v28 = vsel %vm819_vm2, %v4429_v53, %v4428_v7  ;;  %v1125_v19 = vmax.f32 %v1093_v11, 0.0  ;;  %v4431_v47 = vld [vmem:[#allocation87_spill] sm:$0xff] }
 0x30d   :  { %v1042_v54 = vsel %vm1036_vm3, %v4422_v25, %v4421_v60  ;;  %v224_v25 = vadd.f32 %v2274_v26, %v182_v61  ;;  %v1043_v61 = vsel %vm1036_vm3, %v4431_v47, %v4430_v36  ;;  %v235_v4 = vadd.f32 %v2274_v26, %v193_v13  ;;  %v4432_v34 = vld [vmem:[#allocation15_spill] sm:$0xff]  ;;  %v4435_v47 = vld [vmem:[#allocation10_spill] sm:$0xff] }
 0x30e   :  { %v1095_v20 = vadd.f32 %v1042_v54, %v878_v42  ;;  %v195_v14 = vmul.f32 %v2900_v5, %v4432_v34  ;;  %v829_v11 = vsel %vm819_vm2, %v4434_v33, %v4433_v18  ;;  %v880_v53 = vadd.f32 %v826_v15, %v663_v1 }
 0x30f   :  { %v665_v7 = vadd.f32 %v610_v39, %v448_v62  ;;  %v450_v54 = vadd.f32 %v3078_v41, %v233_v51  ;;  %v441_v42 = vadd.f32 %v2526_v23, %v224_v25  ;;  %v188_v13 = vmul.f32 %v2900_v5, %v4435_v47  ;;  %v4437_v62 = vld [vmem:[#allocation83_spill] sm:$0xff]  ;;  %v4439_v23 = vld [vmem:[#allocation72_spill] sm:$0xff]  ;;  %v4440_v51 = vld [vmem:[#allocation94_spill] sm:$0xff] }
 0x310   :  { %1409 = vperm.xlu0 %2117, %v4427_v50   ;;  %1298 = vrot.lane.b32.xlu1 %v1231_v16, %s2173_s7  ;;  %v1233_v16 = vmul.f32 %v3126_v21, %v3214_v55  ;;  %v4436_v36 = vmov 4   ;;  %v3245_v55 = vmul.f32 %v3032_v12, %v1125_v19  ;;  %v228_v33 = vadd.f32 %v2274_v26, %v186_v40  ;;  %v4438_v41 = vld [vmem:[#allocation71_spill] sm:$0xff]  ;;  %v4441_v25 = vld [vmem:[#allocation89_spill] sm:$0xff] }
 0x311   :  { %v1127_v1 = vmax.f32 %v1095_v20, 0.0  ;;  %v1097_v39 = vadd.f32 %v1043_v61, %v880_v53  ;;  %v830_v15 = vsel %vm819_vm2, %v4439_v23, %v4438_v41  ;;  %v1044_v27 = vsel %vm1036_vm3, %v4441_v25, %v4440_v51  ;;  %v4442_v61 = vld [vmem:[#allocation73_spill] sm:$0xff]  ;;  %v4443_v53 = vld [vmem:[#allocation74_spill] sm:$0xff] }
 0x312   :  { %v452_v18 = vadd.f32 %v3083_v44, %v235_v4  ;;  %v882_v19 = vadd.f32 %v827_v2, %v665_v7  ;;  %v667_v32 = vadd.f32 %v3150_v17, %v450_v54  ;;  %v197_v40 = vmul.f32 %v2902_v52, %v4432_v34  ;;  %v4444_v4 = vld [vmem:[#allocation75_spill] sm:$0xff]  ;;  %v4445_v54 = vld [vmem:[#allocation76_spill] sm:$0xff] }
 0x313   :  { %v1236_v20 = vmul.f32 %v3126_v21, %v3245_v55  ;;  %v3265_v23 = vsel %vm819_vm2, %v4443_v53, %v4442_v61  ;;  %v658_v25 = vadd.f32 %v2602_v3, %v441_v42  ;;  %v443_v44 = vadd.f32 %v2533_v29, %v226_v38  ;;  %v4446_v3 = vld [vmem:[#allocation96_spill] sm:$0xff]  ;;  %v4447_v29 = vld [vmem:[#allocation91_spill] sm:$0xff] }
 0x314   :  { %2119 = vset.pattern.permute.xlu0 %v4436_v36  ;;  %1302 = vrot.lane.b32.xlu1 %v1233_v16, %s2173_s7  ;;  %v237_v16 = vadd.f32 %v2264_v22, %v195_v14  ;;  %v230_v14 = vadd.f32 %v2264_v22, %v188_v13  ;;  %v445_v17 = vadd.f32 %v2538_v35, %v228_v33  ;;  %v1129_v2 = vmax.f32 %v1097_v39, 0.0 }
 0x315   :  { %1773 = vperm.xlu0 %2119, %v4437_v62   ;;  %v3273_v34 = vmul.f32 %v3032_v12, %v1127_v1  ;;  %v1099_v7 = vadd.f32 %v1044_v27, %v882_v19  ;;  %v3279_v53 = vsel %vm819_vm2, %v4445_v54, %v4444_v4  ;;  %v1045_v42 = vsel %vm1036_vm3, %v4447_v29, %v4446_v3  ;;  %v4448_v1 = vld [vmem:[#allocation17_spill] sm:$0xff] }
 0x316   :  { %v669_v38 = vadd.f32 %v3155_v10, %v452_v18  ;;  %v454_v35 = vadd.f32 %v3088_v49, %v237_v16  ;;  %v884_v13 = vadd.f32 %v828_v28, %v667_v32  ;;  %v239_v33 = vadd.f32 %v2274_v26, %v197_v40  ;;  %v4451_v40 = vld [vmem:[#allocation93_spill] sm:$0xff] }
 0x317   :  { %v199_v39 = vmul.f32 %v2900_v5, %v4448_v1  ;;  %v1238_v27 = vmul.f32 %v3051_v48, %v3273_v34  ;;  %v875_v19 = vadd.f32 %v2730_v8, %v658_v25  ;;  %v447_v54 = vadd.f32 %v2542_v43, %v230_v14  ;;  %v4450_v43 = vld [vmem:[#allocation97_spill] sm:$0xff] }
 0x318   :  { %1405 = vperm.xlu1 %2116, %v4437_v62   ;;  %v190_v18 = vmul.f32 %v2902_v52, %v4435_v47  ;;  %v4449_v10 = vmov 3   ;;  %v662_v49 = vadd.f32 %v4390_v59, %v445_v17  ;;  %v3299_v32 = vmul.f32 %v3032_v12, %v1129_v2 }
 0x319   :  { %1308 = vrot.lane.b32.xlu0 %v1236_v20, %s2173_s7  ;;  %v660_v20 = vadd.f32 %v4388_v37, %v443_v44  ;;  %v1131_v28 = vmax.f32 %v1099_v7, 0.0  ;;  %v1101_v16 = vadd.f32 %v1045_v42, %v884_v13  ;;  %v1092_v8 = vadd.f32 %v2920_v56, %v875_v19  ;;  %v4453_v13 = vld [vmem:[#allocation99_spill] sm:$0xff] }
 0x31a   :  { %v886_v37 = vadd.f32 %v829_v11, %v669_v38  ;;  %v1046_v47 = vsel %vm1036_vm3, %v4451_v40, %v4450_v43  ;;  %v671_v25 = vadd.f32 %v3160_v0, %v454_v35  ;;  %v456_v59 = vadd.f32 %v3093_v46, %v239_v33  ;;  %v4452_v11 = vld [vmem:[#allocation12_spill] sm:$0xff]  ;;  %v4454_v33 = vld [vmem:[#allocation95_spill] sm:$0xff] }
 0x31b   :  { %v241_v44 = vadd.f32 %v2264_v22, %v199_v39  ;;  %v201_v14 = vmul.f32 %v2902_v52, %v4448_v1  ;;  %v1240_v17 = vmul.f32 %v3126_v21, %v3299_v32  ;;  %v232_v56 = vadd.f32 %v2274_v26, %v190_v18 }
 0x31c   :  { %2118 = vset.pattern.permute.xlu1 %v4449_v10  ;;  %v192_v2 = vmul.f32 %v2900_v5, %v4452_v11  ;;  %v194_v0 = vmul.f32 %v2902_v52, %v4452_v11  ;;  %v664_v46 = vadd.f32 %v4392_v31, %v447_v54  ;;  %v3322_v7 = vmul.f32 %v3032_v12, %v1131_v28  ;;  %v4461_v11 = vld [vmem:[#allocation21_spill] sm:$0xff] }
 0x31d   :  { %1312 = vrot.lane.b32.xlu0 %v1238_v27, %s2173_s7  ;;  %1589 = vperm.xlu1 %2118, %v4437_v62   ;;  %v877_v62 = vadd.f32 %v4404_v9, %v660_v20  ;;  %v1133_v29 = vmax.f32 %v1101_v16, 0.0  ;;  %v1103_v42 = vadd.f32 %v1046_v47, %v886_v37  ;;  %v1124_v9 = vmax.f32 %v1092_v8, 0.0  ;;  %v4457_v8 = vld [vmem:[#allocation98_spill] sm:$0xff] }
 0x31e   :  { %v888_v35 = vadd.f32 %v830_v15, %v671_v25  ;;  %v1047_v1 = vsel %vm1036_vm3, %v4454_v33, %v4453_v13  ;;  %v673_v39 = vadd.f32 %v3178_v57, %v456_v59  ;;  %v458_v31 = vadd.f32 %v3102_v63, %v241_v44  ;;  %v4455_v57 = vld [vmem:[#allocation14_spill] sm:$0xff]  ;;  %v4458_v59 = vld [vmem:[#allocation63_spill] sm:$0xff] }
 0x31f   :  { %v1094_v38 = vadd.f32 %v4406_v30, %v877_v62  ;;  %v243_v27 = vadd.f32 %v2274_v26, %v201_v14  ;;  %v1242_v19 = vmul.f32 %v3051_v48, %v3322_v7  ;;  %v879_v20 = vadd.f32 %v4417_v6, %v662_v49  ;;  %v4456_v49 = vld [vmem:[#allocation101_spill] sm:$0xff]  ;;  %v4459_v14 = vld [vmem:[#allocation44_spill] sm:$0xff] }
 0x320   :  { %v449_v54 = vadd.f32 %v2546_v45, %v232_v56  ;;  %v234_v30 = vadd.f32 %v2264_v22, %v192_v2  ;;  %v236_v15 = vadd.f32 %v2274_v26, %v194_v0  ;;  %v3340_v18 = vmul.f32 %v3032_v12, %v1133_v29 }
 0x321   :  { %1316 = vrot.lane.b32.xlu0 %v1240_v17, %s2173_s7  ;;  %1593 = vperm.xlu1 %2118, %v4427_v50   ;;  %v1135_v10 = vmax.f32 %v1103_v42, 0.0  ;;  %v196_v63 = vmul.f32 %v2900_v5, %v4455_v57  ;;  %v1105_v28 = vadd.f32 %v1047_v1, %v888_v35  ;;  %v3346_v16 = vmul.f32 0.0, %v1124_v9  ;;  %v4463_v42 = vld [vmem:[#allocation103_spill] sm:$0xff]  ;;  %v4464_v9 = vld [vmem:[#allocation100_spill] sm:$0xff]  ;;  %v4465_v1 = vld [vmem:[#allocation30_spill] sm:$0xff] }
 0x322   :  { %v1126_v6 = vmax.f32 %v1094_v38, 0.0  ;;  %v1096_v45 = vadd.f32 %v4421_v60, %v879_v20  ;;  %v1048_v37 = vsel %vm1036_vm3, %v4457_v8, %v4456_v49  ;;  %v890_v40 = vadd.f32 %v3265_v23, %v673_v39  ;;  %v4460_v60 = vld [vmem:[#allocation20_spill] sm:$0xff]  ;;  %v4467_v20 = vld [vmem:[#allocation46_spill] sm:$0xff] }
 0x323   :  { %v675_v47 = vadd.f32 %v3189_v24, %v458_v31  ;;  %v460_v25 = vadd.f32 %v3115_v58, %v243_v27  ;;  %v881_v44 = vadd.f32 %v4458_v59, %v664_v46  ;;  %v666_v17 = vadd.f32 %v4459_v14, %v449_v54  ;;  %v4462_v46 = vld [vmem:[#allocation92_spill] sm:$0xff]  ;;  %v4466_v27 = vld [vmem:[#allocation65_spill] sm:$0xff] }
 0x324   :  { %v451_v62 = vadd.f32 %v4460_v60, %v234_v30  ;;  %v1235_v56 = vmul.f32 %v3051_v48, %v3346_v16  ;;  %v3365_v23 = vmul.f32 %v3032_v12, %v1135_v10  ;;  %v1137_v24 = vmax.f32 %v1105_v28, 0.0  ;;  %v4468_v10 = vld [vmem:[#allocation77_spill] sm:$0xff]  ;;  %v4469_v28 = vld [vmem:[#allocation78_spill] sm:$0xff] }
 0x325   :  { %1320 = vrot.lane.b32.xlu0 %v1242_v19, %s2173_s7  ;;  %2120 = vset.pattern.permute.xlu1 %v4436_v36  ;;  %v1244_v36 = vmul.f32 %v3126_v21, %v3340_v18  ;;  %v1107_v2 = vadd.f32 %v1048_v37, %v890_v40  ;;  %v3368_v58 = vmul.f32 0.0, %v1126_v6  ;;  %v1128_v0 = vmax.f32 %v1096_v45, 0.0 }
 0x326   :  { %1777 = vperm.xlu1 %2120, %v4427_v50   ;;  %v453_v50 = vadd.f32 %v4461_v11, %v236_v15  ;;  %v1098_v29 = vadd.f32 %v4462_v46, %v881_v44  ;;  %v1049_v38 = vsel %vm1036_vm3, %v4464_v9, %v4463_v42  ;;  %v238_v35 = vadd.f32 %v2264_v22, %v196_v63  ;;  %v4473_v44 = vld [vmem:[#allocation23_spill] sm:$0xff] }
 0x327   :  { %v892_v33 = vadd.f32 %v3279_v53, %v675_v47  ;;  %v677_v39 = vadd.f32 %v4465_v1, %v460_v25  ;;  %v1246_v31 = vmul.f32 %v3051_v48, %v3365_v23  ;;  %v883_v19 = vadd.f32 %v4466_v27, %v666_v17  ;;  %v4471_v47 = vld [vmem:[#allocation102_spill] sm:$0xff]  ;;  %v4478_v27 = vld [vmem:[#allocation25_spill] sm:$0xff] }
 0x328   :  { %v668_v54 = vadd.f32 %v4467_v20, %v451_v62  ;;  %v198_v30 = vmul.f32 %v2902_v52, %v4455_v57  ;;  %v1237_v15 = vmul.f32 %v3126_v21, %v3368_v58  ;;  %v833_v63 = vsel %vm819_vm2, %v4469_v28, %v4468_v10  ;;  %v4470_v57 = vld [vmem:[#allocation105_spill] sm:$0xff]  ;;  %v4474_v62 = vld [vmem:[#allocation67_spill] sm:$0xff] }
 0x329   :  { %1324 = vrot.lane.b32.xlu0 %v1244_v36, %s2173_s7  ;;  %v3390_v53 = vmul.f32 %v3032_v12, %v1137_v24  ;;  %v1139_v6 = vmax.f32 %v1107_v2, 0.0  ;;  %v1109_v45 = vadd.f32 %v1049_v38, %v892_v33  ;;  %v3393_v8 = vmul.f32 0.0, %v1128_v0  ;;  %v4472_v36 = vld [vmem:[#allocation47_spill] sm:$0xff]  ;;  %v4475_v24 = vld [vmem:[#allocation16_spill] sm:$0xff] }
 0x32a   :  { %1306 = vrot.lane.b32.xlu1 %v1235_v56, %s2173_s7  ;;  %v1130_v37 = vmax.f32 %v1098_v29, 0.0  ;;  %v1100_v40 = vadd.f32 %v4440_v51, %v883_v19  ;;  %v1050_v25 = vsel %vm1036_vm3, %v4471_v47, %v4470_v57  ;;  %v670_v59 = vadd.f32 %v4472_v36, %v453_v50  ;;  %v4480_v47 = vld [vmem:[#allocation27_spill] sm:$0xff] }
 0x32b   :  { %v455_v14 = vadd.f32 %v4473_v44, %v238_v35  ;;  %v894_v17 = vadd.f32 %v833_v63, %v677_v39  ;;  %v1248_v60 = vmul.f32 %v3126_v21, %v3390_v53  ;;  %v885_v56 = vadd.f32 %v4474_v62, %v668_v54  ;;  %v4476_v35 = vld [vmem:[#allocation69_spill] sm:$0xff] }
 0x32c   :  { %v240_v11 = vadd.f32 %v2274_v26, %v198_v30  ;;  %v200_v51 = vmul.f32 %v2900_v5, %v4475_v24  ;;  %v1239_v2 = vmul.f32 %v3051_v48, %v3393_v8  ;;  %v3411_v0 = vmul.f32 %v3032_v12, %v1139_v6  ;;  %v4477_v39 = vld [vmem:[#allocation49_spill] sm:$0xff] }
 0x32d   :  { %1328 = vrot.lane.b32.xlu0 %v1246_v31, %s2173_s7  ;;  %v1141_v50 = vmax.f32 %v1109_v45, 0.0  ;;  %v1111_v46 = vadd.f32 %v1050_v25, %v894_v17  ;;  %v3414_v29 = vmul.f32 0.0, %v1130_v37  ;;  %v1132_v9 = vmax.f32 %v1100_v40, 0.0  ;;  %v4479_v37 = vld [vmem:[#allocation51_spill] sm:$0xff] }
 0x32e   :  { %1310 = vrot.lane.b32.xlu1 %v1237_v15, %s2173_s7  ;;  %v1102_v38 = vadd.f32 %v4446_v3, %v885_v56  ;;  %v887_v33 = vadd.f32 %v4476_v35, %v670_v59  ;;  %v1250_v1 = vmul.f32 %v3051_v48, %v3411_v0  ;;  %v672_v31 = vadd.f32 %v4477_v39, %v455_v14 }
 0x32f   :  { %v457_v19 = vadd.f32 %v4478_v27, %v240_v11  ;;  %v242_v20 = vadd.f32 %v2264_v22, %v200_v51  ;;  %v1241_v54 = vmul.f32 %v3126_v21, %v3414_v29  ;;  %v3427_v30 = vmul.f32 %v3032_v12, %v1141_v50 }
 0x330   :  { %v1143_v3 = vmax.f32 %v1111_v46, 0.0  ;;  %v3430_v15 = vmul.f32 0.0, %v1132_v9  ;;  %v1134_v28 = vmax.f32 %v1102_v38, 0.0  ;;  %v1104_v63 = vadd.f32 %v4450_v43, %v887_v33 }
 0x331   :  { %1332 = vrot.lane.b32.xlu0 %v1248_v60, %s2173_s7  ;;  %v1252_v6 = vmul.f32 %v3126_v21, %v3427_v30  ;;  %v889_v45 = vadd.f32 %v4438_v41, %v672_v31  ;;  %v674_v40 = vadd.f32 %v4479_v37, %v457_v19  ;;  %v459_v25 = vadd.f32 %v4480_v47, %v242_v20  ;;  %v4481_v60 = vld [vmem:[#allocation53_spill] sm:$0xff] }
 0x332   :  { %1314 = vrot.lane.b32.xlu1 %v1239_v2, %s2173_s7  ;;  %v1243_v36 = vmul.f32 %v3051_v48, %v3430_v15  ;;  %v3442_v59 = vmul.f32 %v3032_v12, %v1143_v3  ;;  %v3445_v43 = vmul.f32 0.0, %v1134_v28  ;;  %v1136_v44 = vmax.f32 %v1104_v63, 0.0  ;;  %v4484_v28 = vld [vmem:[#allocation26_spill] sm:$0xff] }
 0x333   :  { %v1106_v14 = vadd.f32 %v4453_v13, %v889_v45  ;;  %v891_v17 = vadd.f32 %v4442_v61, %v674_v40  ;;  %v676_v62 = vadd.f32 %v4481_v60, %v459_v25  ;;  %v4486_v40 = vld [vmem:[#allocation28_spill] sm:$0xff]  ;;  %v4487_v25 = vld [vmem:[#allocation109_spill] sm:$0xff] }
 0x334   :  { %v1254_v41 = vmul.f32 %v3051_v48, %v3442_v59  ;;  %v1245_v56 = vmul.f32 %v3126_v21, %v3445_v43  ;;  %v3456_v11 = vmul.f32 0.0, %v1136_v44  ;;  %v4488_v44 = vld [vmem:[#allocation38_spill] sm:$0xff] }
 0x335   :  { %1336 = vrot.lane.b32.xlu0 %v1250_v1, %s2173_s7  ;;  %v1138_v51 = vmax.f32 %v1106_v14, 0.0  ;;  %v1108_v2 = vadd.f32 %v4456_v49, %v891_v17  ;;  %v893_v13 = vadd.f32 %v4444_v4, %v676_v62  ;;  %v4490_v62 = vld [vmem:[#allocation11_spill] sm:$0xff] }
 0x336   :  { %1318 = vrot.lane.b32.xlu1 %v1241_v54, %s2173_s7  ;;  %v1247_v50 = vmul.f32 %v3051_v48, %v3456_v11 }
 0x337   :  { %v3463_v61 = vmul.f32 0.0, %v1138_v51  ;;  %v1140_v46 = vmax.f32 %v1108_v2, 0.0  ;;  %v1110_v9 = vadd.f32 %v4463_v42, %v893_v13  ;;  %v202_v13 = vmul.f32 %v2902_v52, %v4475_v24 }
 0x339   :  { %1340 = vrot.lane.b32.xlu0 %v1252_v6, %s2173_s7  ;;  %v1249_v38 = vmul.f32 %v3126_v21, %v3463_v61  ;;  %v3469_v35 = vmul.f32 0.0, %v1140_v46  ;;  %v1142_v49 = vmax.f32 %v1110_v9, 0.0  ;;  %v4485_v6 = vld [vmem:[#allocation22_spill] sm:$0xff]  ;;  %v244_v9 = vadd.f32 %v2274_v26, %v202_v13 }
 0x33a   :  { %1322 = vrot.lane.b32.xlu1 %v1243_v36, %s2173_s7 }
 0x33b   :  { %v1251_v4 = vmul.f32 %v3051_v48, %v3469_v35  ;;  %v3474_v33 = vmul.f32 0.0, %v1142_v49 }
 0x33d   :  { %1344 = vrot.lane.b32.xlu0 %v1254_v41, %s2173_s7  ;;  %v1253_v42 = vmul.f32 %v3126_v21, %v3474_v33  ;;  %v4489_v41 = vld [vmem:[#allocation24_spill] sm:$0xff] }
 0x33e   :  { %1326 = vrot.lane.b32.xlu1 %v1245_v56, %s2173_s7 }
 0x342   :  { %1330 = vrot.lane.b32.xlu1 %v1247_v50, %s2173_s7 }
 0x346   :  { %1334 = vrot.lane.b32.xlu1 %v1249_v38, %s2173_s7 }
 0x34a   :  { %1338 = vrot.lane.b32.xlu1 %v1251_v4, %s2173_s7  ;;  %v4491_v4 = vld [vmem:[#allocation29_spill] sm:$0xff] }
 0x34e   :  { %1342 = vrot.lane.b32.xlu1 %v1253_v42, %s2173_s7  ;;  %v461_v42 = vadd.f32 %v4491_v4, %v244_v9  ;;  %v4494_v9 = vld [vmem:[#allocation18_spill] sm:$0xff] }
 0x372   :  { %v3484_v31 = vpop.permute.xlu0 %1296 }
 0x37a   :  { %v3480_v1 = vpop.permute.xlu1 %1292  ;;  %v3488_v19 = vpop.permute.xlu0 %1300 }
 0x37b   :  { %4482 = vst [vmem:[#allocation35_spill] sm:$0xff] %v3488_v19 }
 0x37e   :  { %v3482_v39 = vpop.permute.xlu1 %1294  ;;  %v3492_v54 = vpop.permute.xlu0 %1304 }
 0x382   :  { %v3486_v27 = vpop.permute.xlu1 %1298 }
 0x386   :  { %v3490_v20 = vpop.permute.xlu1 %1302 }
 0x387   :  { %4483 = vst [vmem:[#allocation40_spill] sm:$0xff] %v3490_v20 }
 0x38b   :  { %v3500_v37 = vpop.permute.xlu0 %1409 }
 0x38c   :  { %v1415_v47 = vmul.f32 %v3500_v37, %v4486_v40  ;;  %v1414_v36 = vmul.f32 %v3500_v37, %v4487_v25  ;;  %v1419_v60 = vmul.f32 %v3500_v37, %v3346_v16  ;;  %v1418_v56 = vmul.f32 %v3500_v37, %v4490_v62 }
 0x38d   :  { %v1423_v50 = vmul.f32 %v3500_v37, %v3393_v8  ;;  %v1422_v46 = vmul.f32 %v3500_v37, %v3273_v34 }
 0x393   :  { %v3494_v3 = vpop.permute.xlu1 %1405 }
 0x394   :  { %v1413_v63 = vmul.f32 %v3494_v3, %v4484_v28  ;;  %v1412_v45 = vmul.f32 %v3494_v3, %v4485_v6  ;;  %v1417_v14 = vmul.f32 %v3494_v3, %v4488_v44  ;;  %v1416_v17 = vmul.f32 %v3494_v3, %v4489_v41 }
 0x395   :  { %v1421_v51 = vmul.f32 %v3494_v3, %v3368_v58  ;;  %v1420_v2 = vmul.f32 %v3494_v3, %v3245_v55  ;;  %v1425_v38 = vmul.f32 %v3494_v3, %v3414_v29  ;;  %v1424_v49 = vmul.f32 %v3494_v3, %v3299_v32 }
 0x396   :  { %1478 = vrot.lane.b32.xlu0 %v1413_v63, %s2175_s8  ;;  %1476 = vrot.lane.b32.xlu1 %v1412_v45, %s2175_s8  ;;  %v1427_v63 = vmul.f32 %v3500_v37, %v3430_v15  ;;  %v1426_v45 = vmul.f32 %v3500_v37, %v3322_v7 }
 0x398   :  { %v3543_v24 = vpop.permute.xlu1 %1589 }
 0x399   :  { %v1601_v4 = vmul.f32 %v3543_v24, %v4488_v44 }
 0x39a   :  { %1482 = vrot.lane.b32.xlu0 %v1415_v47, %s2175_s8  ;;  %1480 = vrot.lane.b32.xlu1 %v1414_v36, %s2175_s8  ;;  %v4492_v47 = vld [vmem:[#allocation55_spill] sm:$0xff] }
 0x39b   :  { %v678_v36 = vadd.f32 %v4492_v47, %v461_v42  ;;  %v1600_v42 = vmul.f32 %v3543_v24, %v4489_v41 }
 0x39e   :  { %1486 = vrot.lane.b32.xlu0 %v1417_v14, %s2175_s8  ;;  %1484 = vrot.lane.b32.xlu1 %v1416_v17, %s2175_s8  ;;  %v1597_v14 = vmul.f32 %v3543_v24, %v4484_v28  ;;  %v1596_v17 = vmul.f32 %v3543_v24, %v4485_v6 }
 0x3a2   :  { %1490 = vrot.lane.b32.xlu0 %v1419_v60, %s2175_s8  ;;  %1488 = vrot.lane.b32.xlu1 %v1418_v56, %s2175_s8  ;;  %v3557_v60 = vpop.permute.xlu1 %1593  ;;  %v4493_v56 = vld [vmem:[#allocation19_spill] sm:$0xff] }
 0x3a3   :  { %v1599_v13 = vmul.f32 %v3557_v60, %v4486_v40 }
 0x3a6   :  { %1494 = vrot.lane.b32.xlu0 %v1421_v51, %s2175_s8  ;;  %1492 = vrot.lane.b32.xlu1 %v1420_v2, %s2175_s8  ;;  %v203_v51 = vmul.f32 %v2900_v5, %v4493_v56  ;;  %v895_v2 = vadd.f32 %v4468_v10, %v678_v36  ;;  %v205_v10 = vmul.f32 %v2902_v52, %v4493_v56 }
 0x3a7   :  { %v1603_v56 = vmul.f32 %v3557_v60, %v3346_v16 }
 0x3aa   :  { %1498 = vrot.lane.b32.xlu0 %v1423_v50, %s2175_s8  ;;  %1496 = vrot.lane.b32.xlu1 %v1422_v46, %s2175_s8  ;;  %v1598_v50 = vmul.f32 %v3557_v60, %v4487_v25  ;;  %v1112_v46 = vadd.f32 %v4470_v57, %v895_v2  ;;  %v4496_v57 = vld [vmem:[#allocation32_spill] sm:$0xff]  ;;  %v4497_v2 = vld [vmem:[#allocation57_spill] sm:$0xff] }
 0x3ac   :  { %v1144_v47 = vmax.f32 %v1112_v46, 0.0 }
 0x3ae   :  { %1502 = vrot.lane.b32.xlu0 %v1425_v38, %s2175_s8  ;;  %1500 = vrot.lane.b32.xlu1 %v1424_v49, %s2175_s8  ;;  %v204_v38 = vmul.f32 %v2900_v5, %v4494_v9  ;;  %v245_v49 = vadd.f32 %v2264_v22, %v203_v51  ;;  %v1602_v51 = vmul.f32 %v3557_v60, %v4490_v62  ;;  %v3596_v46 = vmul.f32 0.0, %v1144_v47  ;;  %v4502_v47 = vld [vmem:[#allocation80_spill] sm:$0xff] }
 0x3b0   :  { %v246_v5 = vadd.f32 %v2264_v22, %v204_v38  ;;  %v4499_v22 = vld [vmem:[#allocation33_spill] sm:$0xff] }
 0x3b2   :  { %1506 = vrot.lane.b32.xlu0 %v1427_v63, %s2175_s8  ;;  %1504 = vrot.lane.b32.xlu1 %v1426_v45, %s2175_s8  ;;  %v4495_v63 = vld [vmem:[#allocation31_spill] sm:$0xff] }
 0x3b3   :  { %v400_v45 = vsel %vm385_vm0, %v4496_v57, %v4495_v63  ;;  %v463_v38 = vadd.f32 %v4495_v63, %v246_v5  ;;  %v1255_v57 = vmul.f32 %v3051_v48, %v3596_v46  ;;  %v4504_v63 = vld [vmem:[#allocation56_spill] sm:$0xff] }
 0x3b4   :  { %v462_v36 = vadd.f32 %v400_v45, %v245_v49  ;;  %v4501_v45 = vld [vmem:[#allocation79_spill] sm:$0xff] }
 0x3b6   :  { %1662 = vrot.lane.b32.xlu0 %v1597_v14, %s2177_s9  ;;  %1660 = vrot.lane.b32.xlu1 %v1596_v17, %s2177_s9  ;;  %v206_v14 = vmul.f32 %v2902_v52, %v4494_v9  ;;  %v247_v17 = vadd.f32 %v2274_v26, %v205_v10  ;;  %v4500_v52 = vld [vmem:[#allocation34_spill] sm:$0xff] }
 0x3b7   :  { %v401_v9 = vsel %vm385_vm0, %v4500_v52, %v4499_v22 }
 0x3b8   :  { %v248_v10 = vadd.f32 %v2274_v26, %v206_v14  ;;  %v680_v26 = vadd.f32 %v4497_v2, %v463_v38  ;;  %v4505_v14 = vld [vmem:[#allocation107_spill] sm:$0xff]  ;;  %v4508_v38 = vld [vmem:[#allocation82_spill] sm:$0xff] }
 0x3ba   :  { %1666 = vrot.lane.b32.xlu0 %v1599_v13, %s2177_s9  ;;  %1664 = vrot.lane.b32.xlu1 %v1598_v50, %s2177_s9  ;;  %v4498_v13 = vld [vmem:[#allocation54_spill] sm:$0xff] }
 0x3bb   :  { %v617_v50 = vsel %vm602_vm1, %v4498_v13, %v4497_v2  ;;  %v4507_v2 = vld [vmem:[#allocation81_spill] sm:$0xff] }
 0x3bc   :  { %v679_v49 = vadd.f32 %v617_v50, %v462_v36  ;;  %v465_v50 = vadd.f32 %v4499_v22, %v248_v10  ;;  %v835_v22 = vsel %vm819_vm2, %v4508_v38, %v4507_v2  ;;  %v4509_v10 = vld [vmem:[#allocation110_spill] sm:$0xff] }
 0x3be   :  { %1670 = vrot.lane.b32.xlu0 %v1601_v4, %s2177_s9  ;;  %1668 = vrot.lane.b32.xlu1 %v1600_v42, %s2177_s9  ;;  %v464_v4 = vadd.f32 %v401_v9, %v247_v17  ;;  %v1428_v42 = vmul.f32 %v3494_v3, %v3340_v18  ;;  %v4506_v17 = vld [vmem:[#allocation104_spill] sm:$0xff]  ;;  %v3622_v9 = vpop.permute.xlu0 %1773 }
 0x3bf   :  { %v1051_v13 = vsel %vm1036_vm3, %v4506_v17, %v4505_v14 }
 0x3c2   :  { %1674 = vrot.lane.b32.xlu0 %v1603_v56, %s2177_s9  ;;  %1672 = vrot.lane.b32.xlu1 %v1602_v51, %s2177_s9  ;;  %v834_v56 = vsel %vm819_vm2, %v4502_v47, %v4501_v45  ;;  %v4503_v51 = vld [vmem:[#allocation58_spill] sm:$0xff]  ;;  %v3624_v47 = vpop.permute.xlu1 %1777  ;;  %v3645_v38 = vpop.permute.xlu0 %1308 }
 0x3c3   :  { %v618_v5 = vsel %vm602_vm1, %v4504_v63, %v4503_v51  ;;  %v896_v36 = vadd.f32 %v834_v56, %v679_v49  ;;  %v897_v49 = vadd.f32 %v4501_v45, %v680_v26  ;;  %v1606_v26 = vmul.f32 %v3557_v60, %v3273_v34 }
 0x3c4   :  { %v681_v52 = vadd.f32 %v618_v5, %v464_v4  ;;  %v4510_v4 = vld [vmem:[#allocation106_spill] sm:$0xff]  ;;  %v682_v5 = vadd.f32 %v4503_v51, %v465_v50  ;;  %v1605_v50 = vmul.f32 %v3543_v24, %v3368_v58 }
 0x3c5   :  { %v1113_v63 = vadd.f32 %v1051_v13, %v896_v36  ;;  %v1052_v56 = vsel %vm1036_vm3, %v4510_v4, %v4509_v10  ;;  %v1604_v36 = vmul.f32 %v3543_v24, %v3245_v55  ;;  %v1431_v13 = vmul.f32 %v3500_v37, %v3456_v11 }
 0x3c6   :  { %1508 = vrot.lane.b32.xlu0 %v1428_v42, %s2175_s8  ;;  %1346 = vrot.lane.b32.xlu1 %v1255_v57, %s2173_s7  ;;  %v1430_v42 = vmul.f32 %v3500_v37, %v3365_v23  ;;  %v1429_v57 = vmul.f32 %v3494_v3, %v3445_v43  ;;  %v898_v17 = vadd.f32 %v835_v22, %v681_v52  ;;  %v3647_v45 = vpop.permute.xlu1 %1306 }
 0x3c7   :  { %v899_v51 = vadd.f32 %v4507_v2, %v682_v5 }
 0x3c8   :  { %v1115_v19 = vadd.f32 %v1052_v56, %v898_v17  ;;  %v1607_v56 = vmul.f32 %v3557_v60, %v3393_v8 }
 0x3ca   :  { %1512 = vrot.lane.b32.xlu0 %v1430_v42, %s2175_s8  ;;  %1510 = vrot.lane.b32.xlu1 %v1429_v57, %s2175_s8  ;;  %v1114_v42 = vadd.f32 %v4505_v14, %v897_v49  ;;  %v1145_v57 = vmax.f32 %v1113_v63, 0.0  ;;  %v1116_v63 = vadd.f32 %v4509_v10, %v899_v51  ;;  %v1147_v22 = vmax.f32 %v1115_v19, 0.0  ;;  %v3662_v49 = vpop.permute.xlu0 %1312  ;;  %v3664_v2 = vpop.permute.xlu1 %1310 }
 0x3cc   :  { %v1146_v52 = vmax.f32 %v1114_v42, 0.0  ;;  %v3657_v14 = vmul.f32 %v3032_v12, %v1145_v57  ;;  %v1148_v17 = vmax.f32 %v1116_v63, 0.0  ;;  %v3673_v10 = vmul.f32 %v3032_v12, %v1147_v22 }
 0x3cd   :  { %v1432_v12 = vmul.f32 %v3494_v3, %v3390_v53  ;;  %v1435_v63 = vmul.f32 %v3500_v37, %v3469_v35 }
 0x3ce   :  { %1676 = vrot.lane.b32.xlu0 %v1604_v36, %s2177_s9  ;;  %1514 = vrot.lane.b32.xlu1 %v1431_v13, %s2175_s8  ;;  %v1256_v4 = vmul.f32 %v3126_v21, %v3657_v14  ;;  %v3670_v5 = vmul.f32 0.0, %v1146_v52  ;;  %v1258_v19 = vmul.f32 %v3051_v48, %v3673_v10  ;;  %v3681_v13 = vmul.f32 0.0, %v1148_v17  ;;  %v3683_v42 = vpop.permute.xlu0 %1316  ;;  %v3685_v57 = vpop.permute.xlu1 %1314 }
 0x3cf   :  { %v1433_v52 = vmul.f32 %v3494_v3, %v3463_v61  ;;  %v1609_v17 = vmul.f32 %v3543_v24, %v3414_v29 }
 0x3d0   :  { %v1257_v36 = vmul.f32 %v3126_v21, %v3670_v5  ;;  %v1259_v51 = vmul.f32 %v3051_v48, %v3681_v13  ;;  %v1608_v48 = vmul.f32 %v3543_v24, %v3299_v32 }
 0x3d2   :  { %1680 = vrot.lane.b32.xlu0 %v1606_v26, %s2177_s9  ;;  %1678 = vrot.lane.b32.xlu1 %v1605_v50, %s2177_s9  ;;  %v3695_v21 = vpop.permute.xlu0 %1320  ;;  %v3697_v26 = vpop.permute.xlu1 %1318  ;;  %v1434_v50 = vmul.f32 %v3500_v37, %v3411_v0 }
 0x3d6   :  { %1348 = vrot.lane.b32.xlu0 %v1256_v4, %s2173_s7  ;;  %1682 = vrot.lane.b32.xlu1 %v1607_v56, %s2177_s9  ;;  %v3709_v22 = vpop.permute.xlu0 %1324  ;;  %v3711_v4 = vpop.permute.xlu1 %1322  ;;  %v1610_v56 = vmul.f32 %v3557_v60, %v3322_v7 }
 0x3d7   :  { %4511 = vst [vmem:[#allocation36_spill] sm:$0xff] %v3709_v22 }
 0x3da   :  { %1352 = vrot.lane.b32.xlu0 %v1258_v19, %s2173_s7  ;;  %1350 = vrot.lane.b32.xlu1 %v1257_v36, %s2173_s7  ;;  %v3721_v19 = vpop.permute.xlu0 %1328  ;;  %v3723_v36 = vpop.permute.xlu1 %1326 }
 0x3db   :  { %4512 = vst [vmem:[#allocation42_spill] sm:$0xff] %v3721_v19  ;;  %4513 = vst [vmem:[#allocation37_spill] sm:$0xff] %v3723_v36 }
 0x3de   :  { %1516 = vrot.lane.b32.xlu0 %v1432_v12, %s2175_s8  ;;  %1354 = vrot.lane.b32.xlu1 %v1259_v51, %s2173_s7  ;;  %v1780_v12 = vmul.f32 %v3622_v9, %v4485_v6  ;;  %v1611_v51 = vmul.f32 %v3557_v60, %v3430_v15 }
 0x3e2   :  { %1520 = vrot.lane.b32.xlu0 %v1434_v50, %s2175_s8  ;;  %1518 = vrot.lane.b32.xlu1 %v1433_v52, %s2175_s8  ;;  %v1781_v50 = vmul.f32 %v3622_v9, %v4484_v28  ;;  %v1782_v52 = vmul.f32 %v3624_v47, %v4487_v25 }
 0x3e6   :  { %1684 = vrot.lane.b32.xlu0 %v1608_v48, %s2177_s9  ;;  %1522 = vrot.lane.b32.xlu1 %v1435_v63, %s2175_s8  ;;  %v3735_v48 = vpop.permute.xlu0 %1332  ;;  %v3737_v63 = vpop.permute.xlu1 %1330 }
 0x3e7   :  { %4514 = vst [vmem:[#allocation39_spill] sm:$0xff] %v3735_v48  ;;  %4515 = vst [vmem:[#allocation41_spill] sm:$0xff] %v3737_v63 }
 0x3ea   :  { %1688 = vrot.lane.b32.xlu0 %v1610_v56, %s2177_s9  ;;  %1686 = vrot.lane.b32.xlu1 %v1609_v17, %s2177_s9  ;;  %v1783_v56 = vmul.f32 %v3624_v47, %v4486_v40  ;;  %v1784_v17 = vmul.f32 %v3622_v9, %v4489_v41  ;;  %v3747_v28 = vpop.permute.xlu0 %1336  ;;  %v1787_v40 = vmul.f32 %v3624_v47, %v3346_v16 }
 0x3eb   :  { %4516 = vst [vmem:[#allocation43_spill] sm:$0xff] %v3747_v28 }
 0x3ee   :  { %1844 = vrot.lane.b32.xlu0 %v1780_v12, %s2178_s10  ;;  %1690 = vrot.lane.b32.xlu1 %v1611_v51, %s2177_s9  ;;  %v3749_v12 = vpop.permute.xlu1 %1334  ;;  %v1785_v51 = vmul.f32 %v3622_v9, %v4488_v44  ;;  %v1437_v44 = vmul.f32 %v3494_v3, %v3474_v33 }
 0x3ef   :  { %4517 = vst [vmem:[#allocation45_spill] sm:$0xff] %v3749_v12 }
 0x3f2   :  { %1846 = vrot.lane.b32.xlu1 %v1781_v50, %s2178_s10  ;;  %1848 = vrot.lane.b32.xlu0 %v1782_v52, %s2178_s10  ;;  %v1786_v50 = vmul.f32 %v3624_v47, %v4490_v62  ;;  %v1436_v52 = vmul.f32 %v3494_v3, %v3427_v30 }
 0x3f6   :  { %1850 = vrot.lane.b32.xlu1 %v1783_v56, %s2178_s10  ;;  %1852 = vrot.lane.b32.xlu0 %v1784_v17, %s2178_s10  ;;  %v3761_v56 = vpop.permute.xlu0 %1340  ;;  %v3763_v17 = vpop.permute.xlu1 %1338 }
 0x3f7   :  { %4518 = vst [vmem:[#allocation59_spill] sm:$0xff] %v3761_v56  ;;  %4519 = vst [vmem:[#allocation60_spill] sm:$0xff] %v3763_v17  ;;  %v1439_v56 = vmul.f32 %v3500_v37, %v3596_v46 }
 0x3fa   :  { %1854 = vrot.lane.b32.xlu1 %v1785_v51, %s2178_s10  ;;  %1856 = vrot.lane.b32.xlu0 %v1786_v50, %s2178_s10  ;;  %v1438_v51 = vmul.f32 %v3500_v37, %v3442_v59  ;;  %v3773_v16 = vpop.permute.xlu0 %1344  ;;  %v3775_v50 = vpop.permute.xlu1 %1342 }
 0x3fb   :  { %4520 = vst [vmem:[#allocation88_spill] sm:$0xff] %v3773_v16  ;;  %4521 = vst [vmem:[#allocation85_spill] sm:$0xff] %v3775_v50 }
 0x3fe   :  { %1858 = vrot.lane.b32.xlu1 %v1787_v40, %s2178_s10  ;;  %1524 = vrot.lane.b32.xlu0 %v1436_v52, %s2175_s8  ;;  %v1612_v40 = vmul.f32 %v3543_v24, %v3340_v18 }
 0x402   :  { %1526 = vrot.lane.b32.xlu1 %v1437_v44, %s2175_s8  ;;  %1528 = vrot.lane.b32.xlu0 %v1438_v51, %s2175_s8  ;;  %v1613_v44 = vmul.f32 %v3543_v24, %v3445_v43  ;;  %v1614_v51 = vmul.f32 %v3557_v60, %v3365_v23 }
 0x406   :  { %1530 = vrot.lane.b32.xlu1 %v1439_v56, %s2175_s8  ;;  %1692 = vrot.lane.b32.xlu0 %v1612_v40, %s2177_s9  ;;  %v1615_v56 = vmul.f32 %v3557_v60, %v3456_v11  ;;  %v1788_v40 = vmul.f32 %v3622_v9, %v3245_v55 }
 0x408   :  { %v3783_v52 = vpop.permute.xlu0 %1478  ;;  %v3785_v28 = vpop.permute.xlu1 %1476 }
 0x40a   :  { %1694 = vrot.lane.b32.xlu1 %v1613_v44, %s2177_s9  ;;  %1696 = vrot.lane.b32.xlu0 %v1614_v51, %s2177_s9  ;;  %v1789_v44 = vmul.f32 %v3622_v9, %v3368_v58  ;;  %v1790_v51 = vmul.f32 %v3624_v47, %v3273_v34 }
 0x40c   :  { %v3793_v50 = vpop.permute.xlu0 %1482  ;;  %v3795_v17 = vpop.permute.xlu1 %1480 }
 0x40e   :  { %1698 = vrot.lane.b32.xlu1 %v1615_v56, %s2177_s9  ;;  %1860 = vrot.lane.b32.xlu0 %v1788_v40, %s2178_s10  ;;  %v1791_v56 = vmul.f32 %v3624_v47, %v3393_v8  ;;  %v1440_v40 = vmul.f32 %v3494_v3, %v3657_v14 }
 0x410   :  { %v3803_v48 = vpop.permute.xlu0 %1486  ;;  %v3805_v12 = vpop.permute.xlu1 %1484 }
 0x411   :  { %4522 = vst [vmem:[#allocation13_spill] sm:$0xff] %v3803_v48  ;;  %4523 = vst [vmem:[#allocation48_spill] sm:$0xff] %v3805_v12 }
 0x412   :  { %1862 = vrot.lane.b32.xlu1 %v1789_v44, %s2178_s10  ;;  %1864 = vrot.lane.b32.xlu0 %v1790_v51, %s2178_s10  ;;  %v1441_v44 = vmul.f32 %v3494_v3, %v3670_v5  ;;  %v1442_v51 = vmul.f32 %v3500_v37, %v3673_v10 }
 0x414   :  { %v1491_v19 = vpop.permute.xlu0 %1490  ;;  %v1489_v63 = vpop.permute.xlu1 %1488 }
 0x415   :  { %v1543_v22 = vsel %vm602_vm1, %v1489_v63, %v1491_v19  ;;  %v1443_v63 = vmul.f32 %v3500_v37, %v3681_v13 }
 0x416   :  { %1866 = vrot.lane.b32.xlu1 %v1791_v56, %s2178_s10  ;;  %1532 = vrot.lane.b32.xlu0 %v1440_v40, %s2175_s8  ;;  %v1616_v56 = vmul.f32 %v3543_v24, %v3390_v53 }
 0x418   :  { %v1495_v58 = vpop.permute.xlu0 %1494  ;;  %v1493_v36 = vpop.permute.xlu1 %1492 }
 0x419   :  { %v3825_v16 = vsel %vm602_vm1, %v1493_v36, %v1495_v58  ;;  %v1617_v58 = vmul.f32 %v3543_v24, %v3463_v61 }
 0x41a   :  { %1534 = vrot.lane.b32.xlu1 %v1441_v44, %s2175_s8  ;;  %1536 = vrot.lane.b32.xlu0 %v1442_v51, %s2175_s8  ;;  %v1618_v44 = vmul.f32 %v3557_v60, %v3411_v0 }
 0x41c   :  { %v1499_v8 = vpop.permute.xlu0 %1498  ;;  %v1497_v19 = vpop.permute.xlu1 %1496 }
 0x41d   :  { %v3834_v3 = vsel %vm602_vm1, %v1497_v19, %v1499_v8  ;;  %v1619_v19 = vmul.f32 %v3557_v60, %v3469_v35 }
 0x41e   :  { %1538 = vrot.lane.b32.xlu1 %v1443_v63, %s2175_s8  ;;  %1700 = vrot.lane.b32.xlu0 %v1616_v56, %s2177_s9  ;;  %v1792_v63 = vmul.f32 %v3622_v9, %v3299_v32 }
 0x420   :  { %v1503_v36 = vpop.permute.xlu0 %1502  ;;  %v1501_v40 = vpop.permute.xlu1 %1500 }
 0x421   :  { %v3843_v37 = vsel %vm602_vm1, %v1501_v40, %v1503_v36 }
 0x422   :  { %1702 = vrot.lane.b32.xlu1 %v1617_v58, %s2177_s9  ;;  %1704 = vrot.lane.b32.xlu0 %v1618_v44, %s2177_s9  ;;  %v1793_v58 = vmul.f32 %v3622_v9, %v3414_v29  ;;  %v1794_v44 = vmul.f32 %v3624_v47, %v3322_v7 }
 0x424   :  { %v1507_v51 = vpop.permute.xlu0 %1506  ;;  %v1505_v8 = vpop.permute.xlu1 %1504 }
 0x425   :  { %v3852_v56 = vsel %vm602_vm1, %v1505_v8, %v1507_v51 }
 0x426   :  { %1706 = vrot.lane.b32.xlu1 %v1619_v19, %s2177_s9  ;;  %1868 = vrot.lane.b32.xlu0 %v1792_v63, %s2178_s10  ;;  %v1795_v19 = vmul.f32 %v3624_v47, %v3430_v15  ;;  %v1620_v63 = vmul.f32 %v3543_v24, %v3427_v30  ;;  %v1622_v15 = vmul.f32 %v3557_v60, %v3442_v59 }
 0x428   :  { %v1663_v36 = vpop.permute.xlu0 %1662  ;;  %v1661_v40 = vpop.permute.xlu1 %1660 }
 0x429   :  { %v3861_v12 = vsel %vm819_vm2, %v1661_v40, %v1663_v36  ;;  %v1359_v36 = vsel %vm385_vm0, %v3492_v54, %v3647_v45  ;;  %v4525_v40 = vld [vmem:[#allocation111_spill] sm:$0xff] }
 0x42a   :  { %1870 = vrot.lane.b32.xlu1 %v1793_v58, %s2178_s10  ;;  %1872 = vrot.lane.b32.xlu0 %v1794_v44, %s2178_s10  ;;  %v1207_v58 = vmul.f32 %v4525_v40, %v4490_v62  ;;  %v1796_v62 = vmul.f32 %v3622_v9, %v3340_v18 }
 0x42c   :  { %v1667_v51 = vpop.permute.xlu0 %1666  ;;  %v1665_v8 = vpop.permute.xlu1 %1664 }
 0x42d   :  { %v3870_v29 = vsel %vm819_vm2, %v1665_v8, %v1667_v51  ;;  %v1621_v51 = vmul.f32 %v3543_v24, %v3474_v33 }
 0x42e   :  { %4524 = vst [vmem:[#allocation50_spill] sm:$0xff] %v3870_v29  ;;  %1874 = vrot.lane.b32.xlu1 %v1795_v19, %s2178_s10  ;;  %1708 = vrot.lane.b32.xlu0 %v1620_v63, %s2177_s9  ;;  %v1391_v19 = vadd.f32 %v1359_v36, %v1207_v58  ;;  %v1623_v29 = vmul.f32 %v3557_v60, %v3596_v46 }
 0x42f   :  { %v1797_v58 = vmul.f32 %v3622_v9, %v3445_v43  ;;  %v1360_v43 = vsel %vm385_vm0, %v3645_v38, %v3664_v2  ;;  %v1209_v38 = vmul.f32 %v4525_v40, %v3273_v34 }
 0x430   :  { %v1671_v44 = vpop.permute.xlu0 %1670  ;;  %v1669_v48 = vpop.permute.xlu1 %1668  ;;  %v1575_v54 = vadd.f32 %v1543_v22, %v1391_v19  ;;  %v1798_v22 = vmul.f32 %v3624_v47, %v3365_v23  ;;  %v4526_v19 = vld [vmem:[#allocation108_spill] sm:$0xff] }
 0x431   :  { %v3884_v8 = vsel %vm819_vm2, %v1669_v48, %v1671_v44 }
 0x432   :  { %1712 = vrot.lane.b32.xlu0 %v1622_v15, %s2177_s9  ;;  %1710 = vrot.lane.b32.xlu1 %v1621_v51, %s2177_s9  ;;  %v1624_v15 = vmul.f32 %v3543_v24, %v3657_v14 }
 0x434   :  { %v1675_v45 = vpop.permute.xlu0 %1674  ;;  %v1673_v63 = vpop.permute.xlu1 %1672 }
 0x435   :  { %v1727_v41 = vsel %vm819_vm2, %v1673_v63, %v1675_v45 }
 0x436   :  { %v3893_v20 = vadd.f32 %v1727_v41, %v1575_v54  ;;  %1876 = vrot.lane.b32.xlu0 %v1796_v62, %s2178_s10  ;;  %1714 = vrot.lane.b32.xlu1 %v1623_v29, %s2177_s9  ;;  %v1799_v29 = vmul.f32 %v3624_v47, %v3456_v11  ;;  %v1208_v54 = vmul.f32 %v4526_v19, %v3245_v55 }
 0x437   :  { %v1626_v62 = vmul.f32 %v3557_v60, %v3673_v10  ;;  %v1625_v11 = vmul.f32 %v3543_v24, %v3670_v5  ;;  %v1361_v55 = vsel %vm385_vm0, %v3662_v49, %v3685_v57  ;;  %v1800_v24 = vmul.f32 %v3622_v9, %v3390_v53 }
 0x438   :  { %v1509_v48 = vpop.permute.xlu0 %1508  ;;  %v3897_v36 = vpop.permute.xlu1 %1346 }
 0x43a   :  { %1880 = vrot.lane.b32.xlu0 %v1798_v22, %s2178_s10  ;;  %1878 = vrot.lane.b32.xlu1 %v1797_v58, %s2178_s10  ;;  %v1392_v22 = vadd.f32 %v1360_v43, %v1208_v54  ;;  %v1801_v54 = vmul.f32 %v3622_v9, %v3463_v61 }
 0x43c   :  { %v1513_v44 = vpop.permute.xlu0 %1512  ;;  %v1511_v41 = vpop.permute.xlu1 %1510  ;;  %v1576_v2 = vadd.f32 %v3825_v16, %v1392_v22  ;;  %v1802_v16 = vmul.f32 %v3624_v47, %v3411_v0 }
 0x43d   :  { %v3910_v51 = vsel %vm602_vm1, %v1509_v48, %v1511_v41 }
 0x43e   :  { %1716 = vrot.lane.b32.xlu0 %v1624_v15, %s2177_s9  ;;  %1882 = vrot.lane.b32.xlu1 %v1799_v29, %s2178_s10  ;;  %v1393_v29 = vadd.f32 %v1361_v55, %v1209_v38  ;;  %v1806_v38 = vmul.f32 %v3624_v47, %v3442_v59 }
 0x440   :  { %v1677_v45 = vpop.permute.xlu0 %1676  ;;  %v1515_v63 = vpop.permute.xlu1 %1514  ;;  %v1577_v34 = vadd.f32 %v3834_v3, %v1393_v29  ;;  %v1804_v3 = vmul.f32 %v3622_v9, %v3427_v30  ;;  %v1210_v29 = vmul.f32 %v4526_v19, %v3299_v32  ;;  %v1363_v32 = vsel %vm385_vm0, %v3695_v21, %v3711_v4 }
 0x441   :  { %v3924_v48 = vsel %vm602_vm1, %v1513_v44, %v1515_v63  ;;  %v1627_v44 = vmul.f32 %v3557_v60, %v3681_v13 }
 0x442   :  { %1720 = vrot.lane.b32.xlu0 %v1626_v62, %s2177_s9  ;;  %1718 = vrot.lane.b32.xlu1 %v1625_v11, %s2177_s9  ;;  %v1803_v11 = vmul.f32 %v3624_v47, %v3469_v35 }
 0x444   :  { %v1681_v58 = vpop.permute.xlu0 %1680  ;;  %v1679_v41 = vpop.permute.xlu1 %1678 }
 0x445   :  { %v1728_v15 = vsel %vm819_vm2, %v1677_v45, %v1679_v41 }
 0x446   :  { %v3939_v43 = vadd.f32 %v1728_v15, %v1576_v2  ;;  %1884 = vrot.lane.b32.xlu0 %v1800_v24, %s2178_s10  ;;  %1722 = vrot.lane.b32.xlu1 %v1627_v44, %s2177_s9  ;;  %v1805_v2 = vmul.f32 %v3622_v9, %v3474_v33  ;;  %v1808_v24 = vmul.f32 %v3622_v9, %v3657_v14 }
 0x447   :  { %v1807_v44 = vmul.f32 %v3624_v47, %v3596_v46  ;;  %v1362_v33 = vsel %vm385_vm0, %v3683_v42, %v3697_v26  ;;  %v1809_v46 = vmul.f32 %v3622_v9, %v3670_v5  ;;  %v1211_v42 = vmul.f32 %v4525_v40, %v3322_v7 }
 0x448   :  { %v1349_v49 = vpop.permute.xlu0 %1348  ;;  %v1683_v57 = vpop.permute.xlu1 %1682  ;;  %v1811_v9 = vmul.f32 %v3624_v47, %v3681_v13  ;;  %v1356_v5 = vsel %vm385_vm0, %v3480_v1, %v3482_v39  ;;  %v1540_v7 = vsel %vm602_vm1, %v3785_v28, %v3783_v52  ;;  %v1357_v1 = vsel %vm385_vm0, %v3484_v31, %v3486_v27 }
 0x449   :  { %v1729_v60 = vsel %vm819_vm2, %v1681_v58, %v1683_v57  ;;  %v1810_v57 = vmul.f32 %v3624_v47, %v3673_v10  ;;  %v1395_v21 = vadd.f32 %v1363_v32, %v1211_v42  ;;  %v1541_v28 = vsel %vm602_vm1, %v3795_v17, %v3793_v50 }
 0x44a   :  { %v3949_v45 = vadd.f32 %v1729_v60, %v1577_v34  ;;  %1888 = vrot.lane.b32.xlu0 %v1802_v16, %s2178_s10  ;;  %1886 = vrot.lane.b32.xlu1 %v1801_v54, %s2178_s10  ;;  %v1394_v54 = vadd.f32 %v1362_v33, %v1210_v29  ;;  %v4530_v29 = vld [vmem:[#allocation13_spill] sm:$0xff] }
 0x44b   :  { %v1579_v47 = vadd.f32 %v3852_v56, %v1395_v21 }
 0x44c   :  { %v1353_v63 = vpop.permute.xlu0 %1352  ;;  %v1351_v62 = vpop.permute.xlu1 %1350  ;;  %v1578_v26 = vadd.f32 %v3843_v37, %v1394_v54 }
 0x44d   :  { %v3958_v22 = vsel %vm385_vm0, %v1349_v49, %v1351_v62 }
 0x44e   :  { %1892 = vrot.lane.b32.xlu0 %v1804_v3, %s2178_s10  ;;  %1890 = vrot.lane.b32.xlu1 %v1803_v11, %s2178_s10  ;;  %v1204_v3 = vmul.f32 %v4526_v19, %v4485_v6  ;;  %v1205_v6 = vmul.f32 %v4525_v40, %v4487_v25 }
 0x450   :  { %v1517_v61 = vpop.permute.xlu0 %1516  ;;  %v1355_v55 = vpop.permute.xlu1 %1354  ;;  %v1388_v37 = vadd.f32 %v1356_v5, %v1204_v3  ;;  %v1389_v52 = vadd.f32 %v1357_v1, %v1205_v6 }
 0x451   :  { %v3967_v58 = vsel %vm385_vm0, %v1353_v63, %v1355_v55 }
 0x452   :  { %1896 = vrot.lane.b32.xlu0 %v1806_v38, %s2178_s10  ;;  %1894 = vrot.lane.b32.xlu1 %v1805_v2, %s2178_s10 }
 0x454   :  { %v1521_v35 = vpop.permute.xlu0 %1520  ;;  %v1519_v41 = vpop.permute.xlu1 %1518 }
 0x455   :  { %v3976_v15 = vsel %vm602_vm1, %v1517_v61, %v1519_v41  ;;  %v1572_v61 = vadd.f32 %v1540_v7, %v1388_v37  ;;  %v4528_v41 = vld [vmem:[#allocation35_spill] sm:$0xff] }
 0x456   :  { %1900 = vrot.lane.b32.xlu0 %v1808_v24, %s2178_s10  ;;  %1898 = vrot.lane.b32.xlu1 %v1807_v44, %s2178_s10  ;;  %v4529_v24 = vld [vmem:[#allocation24_spill] sm:$0xff]  ;;  %v1573_v44 = vadd.f32 %v1541_v28, %v1389_v52  ;;  %v1217_v52 = vmul.f32 %v4525_v40, %v3442_v59  ;;  %v4536_v59 = vld [vmem:[#allocation41_spill] sm:$0xff] }
 0x457   :  { %v1756_v56 = vadd.f32 %v3861_v12, %v1572_v61  ;;  %v1206_v25 = vmul.f32 %v4526_v19, %v4529_v24 }
 0x458   :  { %v1685_v34 = vpop.permute.xlu0 %1684  ;;  %v1523_v49 = vpop.permute.xlu1 %1522 }
 0x459   :  { %v3990_v16 = vsel %vm602_vm1, %v1521_v35, %v1523_v49  ;;  %v4527_v35 = vld [vmem:[#allocation40_spill] sm:$0xff]  ;;  %v4532_v49 = vld [vmem:[#allocation50_spill] sm:$0xff] }
 0x45a   :  { %1904 = vrot.lane.b32.xlu0 %v1810_v57, %s2178_s10  ;;  %1902 = vrot.lane.b32.xlu1 %v1809_v46, %s2178_s10  ;;  %v1358_v31 = vsel %vm385_vm0, %v4528_v41, %v4527_v35  ;;  %v1757_v12 = vadd.f32 %v4532_v49, %v1573_v44  ;;  %v4535_v35 = vld [vmem:[#allocation36_spill] sm:$0xff]  ;;  %v1213_v49 = vmul.f32 %v4525_v40, %v3365_v23 }
 0x45b   :  { %v1390_v50 = vadd.f32 %v1358_v31, %v1206_v25 }
 0x45c   :  { %v1689_v60 = vpop.permute.xlu0 %1688  ;;  %v1687_v63 = vpop.permute.xlu1 %1686 }
 0x45d   :  { %v1730_v62 = vsel %vm819_vm2, %v1685_v34, %v1687_v63  ;;  %v4531_v34 = vld [vmem:[#allocation48_spill] sm:$0xff] }
 0x45e   :  { %v4008_v4 = vadd.f32 %v1730_v62, %v1578_v26  ;;  %1906 = vrot.lane.b32.xlu1 %v1811_v9, %s2178_s10  ;;  %v1542_v17 = vsel %vm602_vm1, %v4531_v34, %v4530_v29 }
 0x45f   :  { %v1574_v32 = vadd.f32 %v1542_v17, %v1390_v50  ;;  %v4537_v17 = vld [vmem:[#allocation42_spill] sm:$0xff] }
 0x460   :  { %v1845_v13 = vpop.permute.xlu0 %1844  ;;  %v1691_v11 = vpop.permute.xlu1 %1690  ;;  %v1365_v50 = vsel %vm385_vm0, %v4537_v17, %v4536_v59 }
 0x461   :  { %v1731_v39 = vsel %vm819_vm2, %v1689_v60, %v1691_v11  ;;  %v1758_v26 = vadd.f32 %v3884_v8, %v1574_v32  ;;  %v4533_v8 = vld [vmem:[#allocation88_spill] sm:$0xff]  ;;  %v1397_v32 = vadd.f32 %v1365_v50, %v1213_v49 }
 0x462   :  { %v4021_v55 = vadd.f32 %v1731_v39, %v1579_v47  ;;  %v1369_v61 = vsel %vm385_vm0, %v4533_v8, %v3897_v36  ;;  %v1218_v8 = vmul.f32 %v4526_v19, %v3657_v14 }
 0x463   :  { %v1401_v31 = vadd.f32 %v1369_v61, %v1217_v52 }
 0x464   :  { %v1849_v38 = vpop.permute.xlu0 %1848  ;;  %v1847_v2 = vpop.permute.xlu1 %1846  ;;  %v1402_v52 = vadd.f32 %v3958_v22, %v1218_v8 }
 0x465   :  { %v1908_v27 = vsel %vm1036_vm3, %v1845_v13, %v1847_v2  ;;  %v4534_v2 = vld [vmem:[#allocation37_spill] sm:$0xff] }
 0x466   :  { %v1940_v33 = vadd.f32 %v1908_v27, %v1756_v56  ;;  %v1364_v41 = vsel %vm385_vm0, %v4535_v35, %v4534_v2 }
 0x468   :  { %v1853_v57 = vpop.permute.xlu0 %1852  ;;  %v1851_v46 = vpop.permute.xlu1 %1850 }
 0x469   :  { %v1909_v54 = vsel %vm1036_vm3, %v1849_v38, %v1851_v46 }
 0x46a   :  { %v1941_v42 = vadd.f32 %v1909_v54, %v1757_v12 }
 0x46c   :  { %v1956_v60 = vadd.f32 %v1941_v42, %v1940_v33  ;;  %v1857_v63 = vpop.permute.xlu0 %1856  ;;  %v1855_v9 = vpop.permute.xlu1 %1854 }
 0x46d   :  { %v1910_v5 = vsel %vm1036_vm3, %v1853_v57, %v1855_v9  ;;  %v1581_v9 = vadd.f32 %v3924_v48, %v1397_v32 }
 0x46e   :  { %v1957_v62 = vrot.slane %v1956_v60, 4  ;;  %v1942_v3 = vadd.f32 %v1910_v5, %v1758_v26 }
 0x470   :  { %v1958_v21 = vadd.f32 %v1957_v62, %v1956_v60  ;;  %v1525_v7 = vpop.permute.xlu0 %1524  ;;  %v1859_v37 = vpop.permute.xlu1 %1858 }
 0x471   :  { %v1911_v47 = vsel %vm1036_vm3, %v1857_v63, %v1859_v37  ;;  %v4070_v63 = vstv %s4169_s4  ;;  %s2180_s4 = smov 4  }
 0x472   :  { %v1959_v13 = vrot.slane %v1958_v21, 2  ;;  %v1943_v11 = vadd.f32 %v1911_v47, %v3893_v20  ;;  %v1212_v20 = vmul.f32 %v4526_v19, %v3340_v18 }
 0x474   :  { %v1963_v1 = vadd.f32 %v1943_v11, %v1942_v3  ;;  %v1529_v39 = vpop.permute.xlu0 %1528  ;;  %v1527_v6 = vpop.permute.xlu1 %1526  ;;  %v1960_v56 = vadd.f32 %v1959_v13, %v1958_v21  ;;  %v1396_v44 = vadd.f32 %v1364_v41, %v1212_v20 }
 0x475   :  { %v4046_v28 = vsel %vm602_vm1, %v1525_v7, %v1527_v6 }
 0x476   :  { %v1964_v38 = vrot.slane %v1963_v1, 4  ;;  %v1961_v33 = vrot.slane %v1960_v56, 1  ;;  %v1580_v18 = vadd.f32 %v3910_v51, %v1396_v44 }
 0x478   :  { %v1965_v27 = vadd.f32 %v1964_v38, %v1963_v1  ;;  %v1693_v24 = vpop.permute.xlu0 %1692  ;;  %v1531_v25 = vpop.permute.xlu1 %1530  ;;  %v1962_v42 = vadd.f32 %v1961_v33, %v1960_v56 }
 0x479   :  { %v1553_v36 = vsel %vm602_vm1, %v1529_v39, %v1531_v25 }
 0x47a   :  { %v1966_v29 = vrot.slane %v1965_v27, 2  ;;  %v4056_v34 = vadd.f32 %v1553_v36, %v1401_v31  ;;  %v2014_v3 = vadd.f32 %v4070_v63, %v1962_v42 }
 0x47c   :  { %v1967_v12 = vadd.f32 %v1966_v29, %v1965_v27  ;;  %v1697_v57 = vpop.permute.xlu0 %1696  ;;  %v1695_v46 = vpop.permute.xlu1 %1694 }
 0x47d   :  { %v1732_v54 = vsel %vm819_vm2, %v1693_v24, %v1695_v46 }
 0x47e   :  { %v1968_v26 = vrot.slane %v1967_v12, 1  ;;  %v4065_v60 = vadd.f32 %v1732_v54, %v1580_v18 }
 0x480   :  { %v1969_v23 = vadd.f32 %v1968_v26, %v1967_v12  ;;  %v1861_v5 = vpop.permute.xlu0 %1860  ;;  %v1699_v51 = vpop.permute.xlu1 %1698 }
 0x481   :  { %v1733_v62 = vsel %vm819_vm2, %v1697_v57, %v1699_v51 }
 0x482   :  { %v2015_v21 = vadd.f32 %v4070_v63, %v1969_v23  ;;  %v1765_v7 = vadd.f32 %v1733_v62, %v1581_v9 }
 0x484   :  { %v1865_v37 = vpop.permute.xlu0 %1864  ;;  %v1863_v47 = vpop.permute.xlu1 %1862  ;;  %v2031_v13 = vsel %vm2030_vm7, %v2015_v21, %v2014_v3 }
 0x485   :  { %v1912_v11 = vsel %vm1036_vm3, %v1861_v5, %v1863_v47 }
 0x486   :  { %v1944_v1 = vadd.f32 %v1912_v11, %v3939_v43 }
 0x488   :  { %v1533_v39 = vpop.permute.xlu0 %1532  ;;  %v1867_v48 = vpop.permute.xlu1 %1866 }
 0x489   :  { %v1913_v6 = vsel %vm1036_vm3, %v1865_v37, %v1867_v48 }
 0x48a   :  { %v1945_v61 = vadd.f32 %v1913_v6, %v3949_v45 }
 0x48c   :  { %v1970_v56 = vadd.f32 %v1945_v61, %v1944_v1  ;;  %v4083_v38 = vpop.permute.xlu0 %1536  ;;  %v1535_v2 = vpop.permute.xlu1 %1534 }
 0x48d   :  { %v1554_v35 = vsel %vm602_vm1, %v1533_v39, %v1535_v2 }
 0x48e   :  { %v1971_v41 = vrot.slane %v1970_v56, 4  ;;  %v4086_v20 = vadd.f32 %v1554_v35, %v1402_v52 }
 0x490   :  { %v1972_v43 = vadd.f32 %v1971_v41, %v1970_v56  ;;  %v1701_v31 = vpop.permute.xlu0 %1700  ;;  %v4088_v27 = vpop.permute.xlu1 %1538 }
 0x492   :  { %v1973_v24 = vrot.slane %v1972_v43, 2 }
 0x494   :  { %v1974_v25 = vadd.f32 %v1973_v24, %v1972_v43  ;;  %v1705_v14 = vpop.permute.xlu0 %1704  ;;  %v1703_v36 = vpop.permute.xlu1 %1702  ;;  %v4538_v24 = vld [vmem:[#allocation45_spill] sm:$0xff] }
 0x496   :  { %v1975_v45 = vrot.slane %v1974_v25, 1 }
 0x498   :  { %v1976_v44 = vadd.f32 %v1975_v45, %v1974_v25  ;;  %v1869_v22 = vpop.permute.xlu0 %1868  ;;  %v1707_v33 = vpop.permute.xlu1 %1706  ;;  %v4539_v25 = vld [vmem:[#allocation39_spill] sm:$0xff] }
 0x499   :  { %v1366_v45 = vsel %vm385_vm0, %v4539_v25, %v4538_v24 }
 0x49a   :  { %v2016_v29 = vadd.f32 %v4070_v63, %v1976_v44  ;;  %v4540_v44 = vld [vmem:[#allocation60_spill] sm:$0xff] }
 0x49c   :  { %v1873_v59 = vpop.permute.xlu0 %1872  ;;  %v1871_v17 = vpop.permute.xlu1 %1870  ;;  %v2033_v50 = vsel %vm2032_vm8, %v2016_v29, %v2031_v13 }
 0x49d   :  { %v1914_v49 = vsel %vm1036_vm3, %v1869_v22, %v1871_v17  ;;  %v4541_v22 = vld [vmem:[#allocation43_spill] sm:$0xff] }
 0x49e   :  { %v1946_v46 = vadd.f32 %v1914_v49, %v4008_v4  ;;  %v1367_v29 = vsel %vm385_vm0, %v4541_v22, %v4540_v44 }
 0x4a0   :  { %v4092_v18 = vpop.permute.xlu0 %1708  ;;  %v1875_v12 = vpop.permute.xlu1 %1874 }
 0x4a1   :  { %v1915_v57 = vsel %vm1036_vm3, %v1873_v59, %v1875_v12 }
 0x4a2   :  { %v1947_v54 = vadd.f32 %v1915_v57, %v4021_v55 }
 0x4a4   :  { %v1977_v32 = vadd.f32 %v1947_v54, %v1946_v46  ;;  %v4097_v42 = vpop.permute.xlu0 %1712  ;;  %v1711_v26 = vpop.permute.xlu1 %1710  ;;  %v1734_v46 = vsel %vm819_vm2, %v1701_v31, %v1703_v36  ;;  %v1735_v54 = vsel %vm819_vm2, %v1705_v14, %v1707_v33 }
 0x4a6   :  { %v1978_v9 = vrot.slane %v1977_v32, 4 }
 0x4a8   :  { %v1979_v23 = vadd.f32 %v1978_v9, %v1977_v32  ;;  %v1877_v5 = vpop.permute.xlu0 %1876  ;;  %v1715_v51 = vpop.permute.xlu1 %1714 }
 0x4aa   :  { %v1980_v62 = vrot.slane %v1979_v23, 2 }
 0x4ac   :  { %v1981_v3 = vadd.f32 %v1980_v62, %v1979_v23  ;;  %v1881_v21 = vpop.permute.xlu0 %1880  ;;  %v1879_v37 = vpop.permute.xlu1 %1878 }
 0x4ad   :  { %v1916_v13 = vsel %vm1036_vm3, %v1877_v5, %v1879_v37  ;;  %v4542_v37 = vld [vmem:[#allocation85_spill] sm:$0xff] }
 0x4ae   :  { %v1982_v47 = vrot.slane %v1981_v3, 1  ;;  %v1948_v48 = vadd.f32 %v1916_v13, %v4065_v60  ;;  %v1214_v60 = vmul.f32 %v4526_v19, %v3390_v53 }
 0x4b0   :  { %v1983_v11 = vadd.f32 %v1982_v47, %v1981_v3  ;;  %v4100_v1 = vpop.permute.xlu0 %1716  ;;  %v1883_v4 = vpop.permute.xlu1 %1882  ;;  %v1398_v17 = vadd.f32 %v1366_v45, %v1214_v60  ;;  %v4543_v47 = vld [vmem:[#allocation59_spill] sm:$0xff] }
 0x4b1   :  { %v1917_v55 = vsel %vm1036_vm3, %v1881_v21, %v1883_v4  ;;  %v1368_v13 = vsel %vm385_vm0, %v4543_v47, %v4542_v37 }
 0x4b2   :  { %v2017_v39 = vadd.f32 %v4070_v63, %v1983_v11  ;;  %v1949_v6 = vadd.f32 %v1917_v55, %v1765_v7  ;;  %v1215_v7 = vmul.f32 %v4525_v40, %v3411_v0  ;;  %v1582_v32 = vadd.f32 %v3976_v15, %v1398_v17 }
 0x4b3   :  { %v1216_v15 = vmul.f32 %v4526_v19, %v3427_v30 }
 0x4b4   :  { %v1984_v8 = vadd.f32 %v1949_v6, %v1948_v48  ;;  %v1721_v61 = vpop.permute.xlu0 %1720  ;;  %v1719_v52 = vpop.permute.xlu1 %1718  ;;  %v2035_v56 = vsel %vm2034_vm9, %v2017_v39, %v2033_v50  ;;  %v1399_v50 = vadd.f32 %v1367_v29, %v1215_v7  ;;  %v1766_v5 = vadd.f32 %v1734_v46, %v1582_v32 }
 0x4b5   :  { %v1400_v33 = vadd.f32 %v1368_v13, %v1216_v15  ;;  %v1736_v48 = vsel %vm819_vm2, %v4092_v18, %v1711_v26  ;;  %v1737_v6 = vsel %vm819_vm2, %v4097_v42, %v1715_v51  ;;  %v1738_v29 = vsel %vm819_vm2, %v4100_v1, %v1719_v52 }
 0x4b6   :  { %v1985_v2 = vrot.slane %v1984_v8, 4  ;;  %v1583_v9 = vadd.f32 %v3990_v16, %v1399_v50  ;;  %v1770_v17 = vadd.f32 %v1738_v29, %v4086_v20 }
 0x4b8   :  { %v1986_v35 = vadd.f32 %v1985_v2, %v1984_v8  ;;  %v1885_v41 = vpop.permute.xlu0 %1884  ;;  %v1723_v43 = vpop.permute.xlu1 %1722  ;;  %v1767_v62 = vadd.f32 %v1735_v54, %v1583_v9  ;;  %v1584_v8 = vadd.f32 %v4046_v28, %v1400_v33  ;;  %v1555_v28 = vsel %vm602_vm1, %v4083_v38, %v4088_v27 }
 0x4b9   :  { %v1739_v60 = vsel %vm819_vm2, %v1721_v61, %v1723_v43 }
 0x4ba   :  { %v1987_v59 = vrot.slane %v1986_v35, 2  ;;  %v1768_v19 = vadd.f32 %v1736_v48, %v1584_v8 }
 0x4bc   :  { %v1988_v49 = vadd.f32 %v1987_v59, %v1986_v35  ;;  %v1889_v12 = vpop.permute.xlu0 %1888  ;;  %v1887_v57 = vpop.permute.xlu1 %1886  ;;  %v1769_v35 = vadd.f32 %v1737_v6, %v4056_v34 }
 0x4bd   :  { %v1918_v53 = vsel %vm1036_vm3, %v1885_v41, %v1887_v57 }
 0x4be   :  { %v1989_v23 = vrot.slane %v1988_v49, 1  ;;  %v1950_v14 = vadd.f32 %v1918_v53, %v1766_v5 }
 0x4c0   :  { %v1990_v0 = vadd.f32 %v1989_v23, %v1988_v49  ;;  %v1893_v3 = vpop.permute.xlu0 %1892  ;;  %v1891_v21 = vpop.permute.xlu1 %1890 }
 0x4c1   :  { %v1919_v31 = vsel %vm1036_vm3, %v1889_v12, %v1891_v21 }
 0x4c2   :  { %v2018_v16 = vadd.f32 %v4070_v63, %v1990_v0  ;;  %v1951_v36 = vadd.f32 %v1919_v31, %v1767_v62 }
 0x4c4   :  { %v1991_v11 = vadd.f32 %v1951_v36, %v1950_v14  ;;  %v1897_v4 = vpop.permute.xlu0 %1896  ;;  %v1895_v55 = vpop.permute.xlu1 %1894  ;;  %v2037_v39 = vsel %vm2036_vm10, %v2018_v16, %v2035_v56  ;;  %v1219_v56 = vmul.f32 %v4525_v40, %v3673_v10 }
 0x4c5   :  { %v1920_v30 = vsel %vm1036_vm3, %v1893_v3, %v1895_v55 }
 0x4c6   :  { %v1992_v2 = vrot.slane %v1991_v11, 4  ;;  %v1952_v18 = vadd.f32 %v1920_v30, %v1768_v19  ;;  %v1403_v42 = vadd.f32 %v3967_v58, %v1219_v56 }
 0x4c8   :  { %v1993_v41 = vadd.f32 %v1992_v2, %v1991_v11  ;;  %v1899_v24 = vpop.permute.xlu1 %1898  ;;  %v1901_v26 = vpop.permute.xlu0 %1900  ;;  %v1587_v7 = vadd.f32 %v1555_v28, %v1403_v42 }
 0x4c9   :  { %v1921_v25 = vsel %vm1036_vm3, %v1897_v4, %v1899_v24 }
 0x4ca   :  { %v1994_v45 = vrot.slane %v1993_v41, 2  ;;  %v1953_v44 = vadd.f32 %v1921_v25, %v1769_v35  ;;  %v1771_v50 = vadd.f32 %v1739_v60, %v1587_v7 }
 0x4cc   :  { %v1995_v51 = vadd.f32 %v1994_v45, %v1993_v41  ;;  %v1998_v22 = vadd.f32 %v1953_v44, %v1952_v18  ;;  %v1903_v34 = vpop.permute.xlu1 %1902  ;;  %v1905_v27 = vpop.permute.xlu0 %1904 }
 0x4cd   :  { %v1922_v59 = vsel %vm1036_vm3, %v1901_v26, %v1903_v34 }
 0x4ce   :  { %v1996_v10 = vrot.slane %v1995_v51, 1  ;;  %v1999_v40 = vrot.slane %v1998_v22, 4  ;;  %v1954_v46 = vadd.f32 %v1922_v59, %v1770_v17 }
 0x4d0   :  { %v1997_v49 = vadd.f32 %v1996_v10, %v1995_v51  ;;  %v2000_v38 = vadd.f32 %v1999_v40, %v1998_v22  ;;  %v1907_v58 = vpop.permute.xlu1 %1906 }
 0x4d1   :  { %v1923_v12 = vsel %vm1036_vm3, %v1905_v27, %v1907_v58 }
 0x4d2   :  { %v2001_v57 = vrot.slane %v2000_v38, 2  ;;  %v1955_v1 = vadd.f32 %v1923_v12, %v1771_v50  ;;  %v2019_v61 = vadd.f32 %v4070_v63, %v1997_v49 }
 0x4d4   :  { %v2002_v52 = vadd.f32 %v2001_v57, %v2000_v38  ;;  %v2005_v43 = vadd.f32 %v1955_v1, %v1954_v46  ;;  %v2039_v54 = vsel %vm2038_vm11, %v2019_v61, %v2037_v39 }
 0x4d6   :  { %v2003_v32 = vrot.slane %v2002_v52, 1  ;;  %v2006_v9 = vrot.slane %v2005_v43, 4 }
 0x4d8   :  { %v2004_v23 = vadd.f32 %v2003_v32, %v2002_v52  ;;  %v2007_v20 = vadd.f32 %v2006_v9, %v2005_v43 }
 0x4da   :  { %v2008_v53 = vrot.slane %v2007_v20, 2  ;;  %v2020_v5 = vadd.f32 %v4070_v63, %v2004_v23 }
 0x4dc   :  { %v2009_v62 = vadd.f32 %v2008_v53, %v2007_v20  ;;  %v2041_v0 = vsel %vm2040_vm12, %v2020_v5, %v2039_v54 }
 0x4de   :  { %v2010_v3 = vrot.slane %v2009_v62, 1 }
 0x4e0   :  { %v2011_v21 = vadd.f32 %v2010_v3, %v2009_v62 }
 0x4e2   :  { %v2021_v37 = vadd.f32 %v4070_v63, %v2011_v21 }
 0x4e4   :  { %v2043_v47 = vsel %vm2042_vm13, %v2021_v37, %v2041_v0 }
 0x4e5   :  { %2046 = vrot.lane.b32.xlu0 %v2043_v47, %s2180_s4  ;;  %2045 = vst [vmem:[#allocation3] sm:$0xff] %v2043_v47 }
 0x4e6   :  { %2136 = shalt.err (!%p2133_p4)
}
 0x4e7   :  { %2069 = dma.vmem_to_hbm [thread:$0]  %s2067_s17, 128, %s4170_s5, [#allocation4]   ;;  %v2123_v63 = vld [vmem:[%s4165_s0] sm:$0xff]  ;;  %v2124_v15 = vld [vmem:[%s4165_s0 + $0x8] sm:$0xff] }
 0x4e8   :  { %s2182_s25 = smov [#allocation5]  }
 0x4e9   :  { %s2076_s26 = sshll.u32 %s2182_s25, 4  ;;  %s2077_s26 = int_to_ptr.vmem [resolvable:$true] %s2076_s26 }
 0x4ea   :  { %s2145_s5 = scalar_lea.vmem %s2077_s26, 128  ;;  %p2150_p6 = scmp.lt.s32.totalorder %s2077_s26, %s2077_s26 }
 0x4eb   :  { %p2146_p5 = scmp.ne.s32.totalorder %s2077_s26, %s2145_s5  ;;  %p2151_p7 = scmp.lt.s32.totalorder %s2145_s5, %s2145_s5 }
 0x4ed   :  { %p2152_p8 = por %p2151_p7, %p2150_p6 }
 0x4ef   :  { %p2153_p9 = pnand %p2152_p8, %p2146_p5 }
 0x557   :  { %v2047_v13 = vpop.permute.xlu0 %2046 }
 0x558   :  { %v2049_v31 = vsub.f32 %v2123_v63, %v2047_v13  ;;  %v2050_v16 = vsub.f32 %v2124_v15, %v2047_v13 }
 0x55a   :  { %2055 = vrot.lane.b32.xlu0 %v2050_v16, %s2178_s10  ;;  %2053 = vrot.lane.b32.xlu1 %v2049_v31, %s2178_s10 }
 0x5cc   :  { %v2056_v14 = vpop.permute.xlu0 %2055  ;;  %v2054_v36 = vpop.permute.xlu1 %2053 }
 0x5cd   :  { %v2057_v33 = vsel %vm1036_vm3, %v2054_v36, %v2056_v14 }
 0x5ce   :  { %2059 = vst [vmem:[#allocation5] sm:$0xff] %v2057_v33 }
 0x5cf   :  { %2156 = shalt.err (!%p2153_p9)
}
 0x5d0   :  { %2079 = dma.vmem_to_hbm [thread:$0]  %s2077_s26, 128, %s4171_s6, [#allocation6]  }
 0x5d1   :  { %2165 = dma.done.wait [#allocation4], 128  }
 0x5d2   :  { %2166 = vsyncadd [#allocation4], 4294967168 }
 0x5d3   :  { %2167 = dma.done.wait [#allocation6], 128  }
 0x5d4   :  { %2168 = vsyncadd [#allocation6], 4294967168 }
 0x5d5   :  { %2086 = vsyncpa [#allocation4], 1 }
 0x5d6   :  { %2087 = vsyncpa [#allocation6], 1 }

</bundles_post_ra>
